<compile_context>
chip_gen: v6e
topology: v6e:2x2x1
jax: 0.10.0
libtpu: 0.0.40
codegen_flags: <defaults>
</compile_context>

<pallas_src>
import functools

import jax
import jax.numpy as jnp
from jax import lax
from jax.experimental import pallas as pl
from jax.experimental.pallas import tpu as pltpu


_VMEM_LIMIT = 32 * 1024 * 1024          # safe scoped-VMEM budget on v5e/v6e/v7x
_BLOCK_ELEMS = 256 * 1024               # ~1 MB f32 per block


# ------------------------------- helpers --------------------------------------

def _round_up(x, m):
    return (x + m - 1) // m * m


def _largest_divisor(n, cap):
    for d in range(min(cap, n), 0, -1):
        if n % d == 0:
            return d
    return 1


def _pick_h_tile(H, W, target_rows):
    """Largest th | H with th*W <= target_rows and th*W % 8 == 0."""
    best = None
    for th in range(1, H + 1):
        if H % th:
            continue
        rows = th * W
        if rows % 8 == 0 and rows <= target_rows:
            best = th
    if best is None:
        best = 1 if (W % 8 == 0) else H
    return best


def _pick_m_tile(M, cap):
    for t in range(min(cap, M), 7, -1):
        if M % t == 0 and t % 8 == 0:
            return t
    return M


# ----------------------------- Pallas kernels ----------------------------------

def _maxpool2x2_kernel(x_ref, o_ref):
    # x_ref: (tr, 2, W/2, 2*C)  -- H-pair in dim 1, W-pair folded into the lane dim
    # o_ref: (tr, W/2, C)
    C = o_ref.shape[-1]
    x = x_ref[...]
    xh = jnp.maximum(x[:, 0], x[:, 1])                     # pool over H pairs
    o_ref[...] = jnp.maximum(xh[:, :, :C], xh[:, :, C:])   # pool over W pairs


def _conv3x3_kernel(*refs, h_tiles, fuse_bn):
    """One M-tile of the 3x3 'same' conv + per-tile channel sum / sum-of-squares.

    Inputs (BlockSpec-pipelined, no manual DMA):
      x_ref  : (1, th+2, W+2, Cin)  halo'd row tile of the zero-padded input
      w_ref  : (3, 3, Cin, Cpad)    zero-padded weights, VMEM-resident
      [sc_ref, sh_ref : (1, Cpad)]  (fuse_bn only) previous-stage BN scale/shift, applied as an
                                    input prologue relu(x*scale+shift); padding positions are
                                    masked back to 0 so 'same' padding stays exact.
    Outputs:
      y_ref  : (th*W, Cpad)         conv output tile (lane-dense, Cpad % 128 == 0)
      st_ref : (1, 2, Cpad)         [sum, sum-of-squares] partials for this tile's BN stats
    """
    if fuse_bn:
        x_ref, w_ref, sc_ref, sh_ref, y_ref, st_ref = refs
    else:
        x_ref, w_ref, y_ref, st_ref = refs

    th = x_ref.shape[1] - 2
    Wp2 = x_ref.shape[2]
    W = Wp2 - 2
    Cin = x_ref.shape[3]

    x = x_ref[0]                                            # (th+2, W+2, Cin)

    if fuse_bn:
        # Apply previous stage's BatchNorm + ReLU on the raw (un-activated) input tile, then
        # zero out the spatial-padding positions (they would otherwise become relu(shift)).
        x = jnp.maximum(x * sc_ref[...].reshape(1, 1, Cin)
                        + sh_ref[...].reshape(1, 1, Cin), 0.0)
        t = pl.program_id(0) % h_tiles
        r_lo = jnp.where(t == 0, 1, 0)                      # first valid halo row
        r_hi = jnp.where(t == h_tiles - 1, th, th + 1)      # last valid halo row
        row = lax.broadcasted_iota(jnp.int32, x.shape, 0)
        col = lax.broadcasted_iota(jnp.int32, x.shape, 1)
        valid = (row >= r_lo) & (row <= r_hi) & (col >= 1) & (col <= W)
        x = jnp.where(valid, x, 0.0)

    # 9 shifted matmuls accumulated locally; single store of the finished tile.
    acc = None
    for kx in range(3):
        xs = x[:, kx:kx + W, :].reshape((th + 2) * W, Cin)
        for ky in range(3):
            tap = jnp.dot(xs[ky * W: ky * W + th * W, :], w_ref[ky, kx],
                          preferred_element_type=jnp.float32)
            acc = tap if acc is None else acc + tap
    y_ref[...] = acc

    s1 = jnp.sum(acc, axis=0, keepdims=True)                # (1, Cpad)
    s2 = jnp.sum(acc * acc, axis=0, keepdims=True)          # (1, Cpad)
    st_ref[0] = jnp.concatenate([s1, s2], axis=0)


def _bn_relu_apply_kernel(y_ref, scale_ref, shift_ref, o_ref):
    # y:(tm,Cpad) * scale:(1,Cpad) + shift:(1,Cpad), ReLU.  Global batch stats.
    o_ref[...] = jnp.maximum(y_ref[...] * scale_ref[...] + shift_ref[...], 0.0)


# -------------------------------- wrappers --------------------------------------

def maxpool2x2(x_nhwc):
    N, H, W, C = x_nhwc.shape
    R = N * H // 2
    Wh, C2 = W // 2, 2 * C
    xr = x_nhwc.reshape(R, 2, Wh, C2)                       # contiguous reshape
    cap = max(1, _BLOCK_ELEMS // (2 * Wh * C2))
    tr = _largest_divisor(R, cap)
    out = pl.pallas_call(
        _maxpool2x2_kernel,
        out_shape=jax.ShapeDtypeStruct((R, Wh, C), x_nhwc.dtype),
        grid=(R // tr,),
        in_specs=[pl.BlockSpec((tr, 2, Wh, C2), lambda i: (i, 0, 0, 0))],
        out_specs=pl.BlockSpec((tr, Wh, C), lambda i: (i, 0, 0)),
        compiler_params=pltpu.CompilerParams(
            dimension_semantics=("parallel",),
            vmem_limit_bytes=_VMEM_LIMIT),
    )(xr)
    return out.reshape(N, H // 2, W // 2, C)


def _halo_tiles(x_nhwc, th):
    """(N,H,W,C) -> (N*h_tiles, th+2, W+2, C) zero-padded, row-halo'd tiles (fused in XLA)."""
    N, H, W, C = x_nhwc.shape
    xp = jnp.pad(x_nhwc, ((0, 0), (1, 1), (1, 1), (0, 0)))
    h_tiles = H // th
    tiles = [xp[:, t * th: t * th + th + 2] for t in range(h_tiles)]
    xt = jnp.stack(tiles, axis=1)                           # (N, h_tiles, th+2, W+2, C)
    return xt.reshape(N * h_tiles, th + 2, W + 2, C), h_tiles


def conv3x3_stats(x_nhwc, w_pad, *, in_scale=None, in_shift=None):
    """3x3 'same' conv (bias folded away) + per-tile BN partial stats.

    If in_scale/in_shift are given, the previous stage's BN+ReLU is fused onto the conv input
    (x_nhwc must then be the *raw* previous-stage conv output)."""
    N, H, W, Cin = x_nhwc.shape
    Cpad = w_pad.shape[-1]
    fuse = in_scale is not None

    target_rows = max(8, min(2048, _BLOCK_ELEMS // max(Cin, Cpad)))
    th = _pick_h_tile(H, W, target_rows)
    xt, h_tiles = _halo_tiles(x_nhwc, th)

    rows = th * W
    M = N * H * W
    n_tiles = N * h_tiles

    kernel = functools.partial(_conv3x3_kernel, h_tiles=h_tiles, fuse_bn=fuse)

    in_specs = [pl.BlockSpec((1, th + 2, W + 2, Cin), lambda m: (m, 0, 0, 0)),
                pl.BlockSpec((3, 3, Cin, Cpad), lambda m: (0, 0, 0, 0))]
    args = [xt, w_pad]
    if fuse:
        in_specs += [pl.BlockSpec((1, Cpad), lambda m: (0, 0)),
                     pl.BlockSpec((1, Cpad), lambda m: (0, 0))]
        args += [in_scale.reshape(1, Cpad), in_shift.reshape(1, Cpad)]

    flops = 2 * M * 9 * Cin * Cpad
    bytes_accessed = (xt.size + w_pad.size + M * Cpad + n_tiles * 2 * Cpad) * 4

    y, st = pl.pallas_call(
        kernel,
        out_shape=(jax.ShapeDtypeStruct((M, Cpad), jnp.float32),
                   jax.ShapeDtypeStruct((n_tiles, 2, Cpad), jnp.float32)),
        grid=(n_tiles,),
        in_specs=in_specs,
        out_specs=(pl.BlockSpec((rows, Cpad), lambda m: (m, 0)),
                   pl.BlockSpec((1, 2, Cpad), lambda m: (m, 0, 0))),
        compiler_params=pltpu.CompilerParams(
            dimension_semantics=("parallel",),
            vmem_limit_bytes=_VMEM_LIMIT),
        cost_estimate=pl.CostEstimate(flops=flops, transcendentals=0,
                                      bytes_accessed=bytes_accessed),
    )(*args)
    return y, st


def bn_relu_apply(y, scale, shift):
    M, Cpad = y.shape
    tm = _pick_m_tile(M, max(8, min(2048, _BLOCK_ELEMS // Cpad)))
    return pl.pallas_call(
        _bn_relu_apply_kernel,
        out_shape=jax.ShapeDtypeStruct((M, Cpad), jnp.float32),
        grid=(M // tm,),
        in_specs=[pl.BlockSpec((tm, Cpad), lambda i: (i, 0)),
                  pl.BlockSpec((1, Cpad), lambda i: (0, 0)),
                  pl.BlockSpec((1, Cpad), lambda i: (0, 0))],
        out_specs=pl.BlockSpec((tm, Cpad), lambda i: (i, 0)),
        compiler_params=pltpu.CompilerParams(
            dimension_semantics=("parallel",),
            vmem_limit_bytes=_VMEM_LIMIT),
    )(y, scale.reshape(1, Cpad), shift.reshape(1, Cpad))


def _bn_affine(st, gamma, beta, M, eps):
    """Reduce per-tile [sum, sumsq] partials (tiny) -> per-channel BN scale/shift."""
    s = jnp.sum(st, axis=0)                                  # (2, Cpad)
    mean = s[0] / M
    var = s[1] / M - mean * mean                             # biased variance
    scale = gamma * lax.rsqrt(var + eps)
    shift = beta - mean * scale
    return scale, shift


def _pack_weights(w_oihw, cin_pad, cout_pad):
    cout, cin = w_oihw.shape[0], w_oihw.shape[1]
    w = jnp.transpose(w_oihw, (2, 3, 1, 0)).astype(jnp.float32)   # (3,3,cin,cout)
    wp = jnp.zeros((3, 3, cin_pad, cout_pad), jnp.float32)
    return wp.at[:, :, :cin, :cout].set(w)


def _pad_vec(v, cpad):
    return jnp.pad(v.astype(jnp.float32), (0, cpad - v.shape[0]))


def down_forward(x_nchw, params, eps=1e-5):
    """Down.forward: MaxPool2d(2) -> (Conv3x3 -> BN(batch stats) -> ReLU) x 2.

    NCHW in / NCHW out (PyTorch convention); runs NHWC with channels zero-padded to a multiple
    of 128 internally.  Conv biases b1/b2 are NOT applied: with training-mode batch-stat
    BatchNorm a per-channel bias is exactly cancelled by the mean subtraction (it must be
    re-added if eval-mode running stats are ever used instead).
    """
    N, Cin, H, W = x_nchw.shape
    assert H % 2 == 0 and W % 2 == 0
    Cout = params["w1"].shape[0]
    Cpad = _round_up(Cout, 128)

    x = jnp.transpose(x_nchw, (0, 2, 3, 1))            # boundary transpose (in)
    x = maxpool2x2(x)                                   # (N, H/2, W/2, Cin)
    Hh, Wh = H // 2, W // 2
    M = N * Hh * Wh

    w1p = _pack_weights(params["w1"], Cin, Cpad)        # (3,3,Cin ,Cpad)
    w2p = _pack_weights(params["w2"], Cpad, Cpad)       # (3,3,Cpad,Cpad)
    g1p, be1p = _pad_vec(params["g1"], Cpad), _pad_vec(params["be1"], Cpad)
    g2p, be2p = _pad_vec(params["g2"], Cpad), _pad_vec(params["be2"], Cpad)

    # Stage 1: conv + per-tile stats; BN1+ReLU1 are applied *inside* the stage-2 conv kernel.
    y1, st1 = conv3x3_stats(x, w1p)                     # (M,Cpad), (tiles,2,Cpad)
    scale1, shift1 = _bn_affine(st1, g1p, be1p, M, eps)

    # Stage 2: fused (BN1+ReLU1) prologue -> conv -> per-tile stats.
    y2, st2 = conv3x3_stats(y1.reshape(N, Hh, Wh, Cpad), w2p,
                            in_scale=scale1, in_shift=shift1)
    scale2, shift2 = _bn_affine(st2, g2p, be2p, M, eps)

    a2 = bn_relu_apply(y2, scale2, shift2).reshape(N, Hh, Wh, Cpad)

    out = a2[..., :Cout]                                # drop channel padding
    return jnp.transpose(out, (0, 3, 1, 2))             # boundary transpose (out)


# ----------------------------- pure-JAX reference --------------------------------

def _ref_down(x_nchw, params, eps=1e-5):
    def conv(x, w, b):
        y = lax.conv_general_dilated(
            x, w, window_strides=(1, 1), padding=((1, 1), (1, 1)),
            dimension_numbers=("NCHW", "OIHW", "NCHW"))
        return y + b[None, :, None, None]

    def bn_relu(x, g, be):
        mean = jnp.mean(x, axis=(0, 2, 3), keepdims=True)
        var = jnp.mean((x - mean) ** 2, axis=(0, 2, 3), keepdims=True)
        xn = (x - mean) * lax.rsqrt(var + eps)
        return jnp.maximum(xn * g[None, :, None, None] + be[None, :, None, None], 0.0)

    x = lax.reduce_window(x_nchw, -jnp.inf, lax.max,
                          (1, 1, 2, 2), (1, 1, 2, 2), "VALID")
    x = bn_relu(conv(x, params["w1"], params["b1"]), params["g1"], params["be1"])
    x = bn_relu(conv(x, params["w2"], params["b2"]), params["g2"], params["be2"])
    return x


# -------------------------------------- main --------------------------------------

if __name__ == "__main__":
    N, Cin, Cout, S = 2, 4, 8, 16          # x is (2, 4, 16, 16) NCHW
    key = jax.random.PRNGKey(0)
    keys = jax.random.split(key, 8)

    x = jax.random.normal(keys[0], (N, Cin, S, S), jnp.float32)
    params = {
        "w1": 0.1 * jax.random.normal(keys[1], (Cout, Cin, 3, 3), jnp.float32),
        "b1": 0.1 * jax.random.normal(keys[2], (Cout,), jnp.float32),
        "g1": 1.0 + 0.1 * jax.random.normal(keys[3], (Cout,), jnp.float32),
        "be1": 0.1 * jax.random.normal(keys[4], (Cout,), jnp.float32),
        "w2": 0.1 * jax.random.normal(keys[5], (Cout, Cout, 3, 3), jnp.float32),
        "b2": 0.1 * jax.random.normal(keys[6], (Cout,), jnp.float32),
        "g2": 1.0 + 0.1 * jax.random.normal(keys[7], (Cout,), jnp.float32),
        "be2": jnp.zeros((Cout,), jnp.float32),
    }

    fwd = jax.jit(down_forward)
    out = jax.block_until_ready(fwd(x, params))
    ref = jax.block_until_ready(_ref_down(x, params))

    assert out.shape == (N, Cout, S // 2, S // 2), out.shape
    max_err = float(jnp.max(jnp.abs(out - ref)))
    assert jnp.allclose(out, ref, atol=1e-4, rtol=1e-4), f"max_err={max_err}"

    print("KERNEL_OK")
</pallas_src>

<mosaic_0001>
module attributes {stable_mosaic.version = 11 : i64} {
  func.func @_conv3x3_kernel(%arg0: i32, %arg1: memref<1x10x10x4xf32, #tpu.memory_space<vmem>>, %arg2: memref<3x3x4x128xf32, #tpu.memory_space<vmem>>, %arg3: memref<64x128xf32, #tpu.memory_space<vmem>>, %arg4: memref<1x2x128xf32, #tpu.memory_space<vmem>>) attributes {dimension_semantics = [#tpu.dimension_semantics<parallel>], iteration_bounds = array<i64: 2>, scalar_prefetch = 0 : i64, scratch_operands = 0 : i64, tpu.core_type = #tpu.core_type<tc>, window_params = [{transform_indices = @transform_0, window_bounds = array<i64: 1, 10, 10, 4>}, {pipeline_mode = #tpu.pipeline_mode<synchronous>, transform_indices = @transform_1, window_bounds = array<i64: 3, 3, 4, 128>}, {transform_indices = @transform_2, window_bounds = array<i64: 64, 128>}, {transform_indices = @transform_3, window_bounds = array<i64: 1, 2, 128>}]} {
    %c0 = arith.constant 0 : index
    %c0_0 = arith.constant 0 : index
    %c0_1 = arith.constant 0 : index
    %c0_2 = arith.constant 0 : index
    %0 = vector.load %arg1[%c0, %c0_0, %c0_1, %c0_2] : memref<1x10x10x4xf32, #tpu.memory_space<vmem>>, vector<1x10x10x4xf32>
    %1 = vector.shape_cast %0 : vector<1x10x10x4xf32> to vector<10x10x4xf32>
    %2 = vector.extract_strided_slice %1 {offsets = [0, 0, 0], sizes = [10, 8, 4], strides = [1, 1, 1]} : vector<10x10x4xf32> to vector<10x8x4xf32>
    %3 = vector.shape_cast %2 : vector<10x8x4xf32> to vector<80x4xf32>
    %4 = vector.extract_strided_slice %3 {offsets = [0, 0], sizes = [64, 4], strides = [1, 1]} : vector<80x4xf32> to vector<64x4xf32>
    %c0_3 = arith.constant 0 : index
    %c0_4 = arith.constant 0 : index
    %c0_5 = arith.constant 0 : index
    %c0_6 = arith.constant 0 : index
    %5 = vector.load %arg2[%c0_3, %c0_4, %c0_5, %c0_6] : memref<3x3x4x128xf32, #tpu.memory_space<vmem>>, vector<1x1x4x128xf32>
    %6 = vector.shape_cast %5 : vector<1x1x4x128xf32> to vector<4x128xf32>
    %cst = arith.constant dense<0.000000e+00> : vector<64x128xf32>
    %7 = tpu.matmul %4, %6, %cst {dimension_numbers = #tpu.dot_dimension_numbers<[1], [0], [0], [1], [0, 0, 1, 1], [], []>} : vector<64x4xf32>, vector<4x128xf32>, vector<64x128xf32> -> vector<64x128xf32>
    %8 = vector.extract_strided_slice %3 {offsets = [8, 0], sizes = [64, 4], strides = [1, 1]} : vector<80x4xf32> to vector<64x4xf32>
    %c1 = arith.constant 1 : index
    %c0_7 = arith.constant 0 : index
    %c0_8 = arith.constant 0 : index
    %c0_9 = arith.constant 0 : index
    %9 = vector.load %arg2[%c1, %c0_7, %c0_8, %c0_9] : memref<3x3x4x128xf32, #tpu.memory_space<vmem>>, vector<1x1x4x128xf32>
    %10 = vector.shape_cast %9 : vector<1x1x4x128xf32> to vector<4x128xf32>
    %cst_10 = arith.constant dense<0.000000e+00> : vector<64x128xf32>
    %11 = tpu.matmul %8, %10, %cst_10 {dimension_numbers = #tpu.dot_dimension_numbers<[1], [0], [0], [1], [0, 0, 1, 1], [], []>} : vector<64x4xf32>, vector<4x128xf32>, vector<64x128xf32> -> vector<64x128xf32>
    %12 = arith.addf %7, %11 : vector<64x128xf32>
    %13 = vector.extract_strided_slice %3 {offsets = [16, 0], sizes = [64, 4], strides = [1, 1]} : vector<80x4xf32> to vector<64x4xf32>
    %c2 = arith.constant 2 : index
    %c0_11 = arith.constant 0 : index
    %c0_12 = arith.constant 0 : index
    %c0_13 = arith.constant 0 : index
    %14 = vector.load %arg2[%c2, %c0_11, %c0_12, %c0_13] : memref<3x3x4x128xf32, #tpu.memory_space<vmem>>, vector<1x1x4x128xf32>
    %15 = vector.shape_cast %14 : vector<1x1x4x128xf32> to vector<4x128xf32>
    %cst_14 = arith.constant dense<0.000000e+00> : vector<64x128xf32>
    %16 = tpu.matmul %13, %15, %cst_14 {dimension_numbers = #tpu.dot_dimension_numbers<[1], [0], [0], [1], [0, 0, 1, 1], [], []>} : vector<64x4xf32>, vector<4x128xf32>, vector<64x128xf32> -> vector<64x128xf32>
    %17 = arith.addf %12, %16 : vector<64x128xf32>
    %18 = vector.extract_strided_slice %1 {offsets = [0, 1, 0], sizes = [10, 8, 4], strides = [1, 1, 1]} : vector<10x10x4xf32> to vector<10x8x4xf32>
    %19 = vector.shape_cast %18 : vector<10x8x4xf32> to vector<80x4xf32>
    %20 = vector.extract_strided_slice %19 {offsets = [0, 0], sizes = [64, 4], strides = [1, 1]} : vector<80x4xf32> to vector<64x4xf32>
    %c0_15 = arith.constant 0 : index
    %c1_16 = arith.constant 1 : index
    %c0_17 = arith.constant 0 : index
    %c0_18 = arith.constant 0 : index
    %21 = vector.load %arg2[%c0_15, %c1_16, %c0_17, %c0_18] : memref<3x3x4x128xf32, #tpu.memory_space<vmem>>, vector<1x1x4x128xf32>
    %22 = vector.shape_cast %21 : vector<1x1x4x128xf32> to vector<4x128xf32>
    %cst_19 = arith.constant dense<0.000000e+00> : vector<64x128xf32>
    %23 = tpu.matmul %20, %22, %cst_19 {dimension_numbers = #tpu.dot_dimension_numbers<[1], [0], [0], [1], [0, 0, 1, 1], [], []>} : vector<64x4xf32>, vector<4x128xf32>, vector<64x128xf32> -> vector<64x128xf32>
    %24 = arith.addf %17, %23 : vector<64x128xf32>
    %25 = vector.extract_strided_slice %19 {offsets = [8, 0], sizes = [64, 4], strides = [1, 1]} : vector<80x4xf32> to vector<64x4xf32>
    %c1_20 = arith.constant 1 : index
    %c1_21 = arith.constant 1 : index
    %c0_22 = arith.constant 0 : index
    %c0_23 = arith.constant 0 : index
    %26 = vector.load %arg2[%c1_20, %c1_21, %c0_22, %c0_23] : memref<3x3x4x128xf32, #tpu.memory_space<vmem>>, vector<1x1x4x128xf32>
    %27 = vector.shape_cast %26 : vector<1x1x4x128xf32> to vector<4x128xf32>
    %cst_24 = arith.constant dense<0.000000e+00> : vector<64x128xf32>
    %28 = tpu.matmul %25, %27, %cst_24 {dimension_numbers = #tpu.dot_dimension_numbers<[1], [0], [0], [1], [0, 0, 1, 1], [], []>} : vector<64x4xf32>, vector<4x128xf32>, vector<64x128xf32> -> vector<64x128xf32>
    %29 = arith.addf %24, %28 : vector<64x128xf32>
    %30 = vector.extract_strided_slice %19 {offsets = [16, 0], sizes = [64, 4], strides = [1, 1]} : vector<80x4xf32> to vector<64x4xf32>
    %c2_25 = arith.constant 2 : index
    %c1_26 = arith.constant 1 : index
    %c0_27 = arith.constant 0 : index
    %c0_28 = arith.constant 0 : index
    %31 = vector.load %arg2[%c2_25, %c1_26, %c0_27, %c0_28] : memref<3x3x4x128xf32, #tpu.memory_space<vmem>>, vector<1x1x4x128xf32>
    %32 = vector.shape_cast %31 : vector<1x1x4x128xf32> to vector<4x128xf32>
    %cst_29 = arith.constant dense<0.000000e+00> : vector<64x128xf32>
    %33 = tpu.matmul %30, %32, %cst_29 {dimension_numbers = #tpu.dot_dimension_numbers<[1], [0], [0], [1], [0, 0, 1, 1], [], []>} : vector<64x4xf32>, vector<4x128xf32>, vector<64x128xf32> -> vector<64x128xf32>
    %34 = arith.addf %29, %33 : vector<64x128xf32>
    %35 = vector.extract_strided_slice %1 {offsets = [0, 2, 0], sizes = [10, 8, 4], strides = [1, 1, 1]} : vector<10x10x4xf32> to vector<10x8x4xf32>
    %36 = vector.shape_cast %35 : vector<10x8x4xf32> to vector<80x4xf32>
    %37 = vector.extract_strided_slice %36 {offsets = [0, 0], sizes = [64, 4], strides = [1, 1]} : vector<80x4xf32> to vector<64x4xf32>
    %c0_30 = arith.constant 0 : index
    %c2_31 = arith.constant 2 : index
    %c0_32 = arith.constant 0 : index
    %c0_33 = arith.constant 0 : index
    %38 = vector.load %arg2[%c0_30, %c2_31, %c0_32, %c0_33] : memref<3x3x4x128xf32, #tpu.memory_space<vmem>>, vector<1x1x4x128xf32>
    %39 = vector.shape_cast %38 : vector<1x1x4x128xf32> to vector<4x128xf32>
    %cst_34 = arith.constant dense<0.000000e+00> : vector<64x128xf32>
    %40 = tpu.matmul %37, %39, %cst_34 {dimension_numbers = #tpu.dot_dimension_numbers<[1], [0], [0], [1], [0, 0, 1, 1], [], []>} : vector<64x4xf32>, vector<4x128xf32>, vector<64x128xf32> -> vector<64x128xf32>
    %41 = arith.addf %34, %40 : vector<64x128xf32>
    %42 = vector.extract_strided_slice %36 {offsets = [8, 0], sizes = [64, 4], strides = [1, 1]} : vector<80x4xf32> to vector<64x4xf32>
    %c1_35 = arith.constant 1 : index
    %c2_36 = arith.constant 2 : index
    %c0_37 = arith.constant 0 : index
    %c0_38 = arith.constant 0 : index
    %43 = vector.load %arg2[%c1_35, %c2_36, %c0_37, %c0_38] : memref<3x3x4x128xf32, #tpu.memory_space<vmem>>, vector<1x1x4x128xf32>
    %44 = vector.shape_cast %43 : vector<1x1x4x128xf32> to vector<4x128xf32>
    %cst_39 = arith.constant dense<0.000000e+00> : vector<64x128xf32>
    %45 = tpu.matmul %42, %44, %cst_39 {dimension_numbers = #tpu.dot_dimension_numbers<[1], [0], [0], [1], [0, 0, 1, 1], [], []>} : vector<64x4xf32>, vector<4x128xf32>, vector<64x128xf32> -> vector<64x128xf32>
    %46 = arith.addf %41, %45 : vector<64x128xf32>
    %47 = vector.extract_strided_slice %36 {offsets = [16, 0], sizes = [64, 4], strides = [1, 1]} : vector<80x4xf32> to vector<64x4xf32>
    %c2_40 = arith.constant 2 : index
    %c2_41 = arith.constant 2 : index
    %c0_42 = arith.constant 0 : index
    %c0_43 = arith.constant 0 : index
    %48 = vector.load %arg2[%c2_40, %c2_41, %c0_42, %c0_43] : memref<3x3x4x128xf32, #tpu.memory_space<vmem>>, vector<1x1x4x128xf32>
    %49 = vector.shape_cast %48 : vector<1x1x4x128xf32> to vector<4x128xf32>
    %cst_44 = arith.constant dense<0.000000e+00> : vector<64x128xf32>
    %50 = tpu.matmul %47, %49, %cst_44 {dimension_numbers = #tpu.dot_dimension_numbers<[1], [0], [0], [1], [0, 0, 1, 1], [], []>} : vector<64x4xf32>, vector<4x128xf32>, vector<64x128xf32> -> vector<64x128xf32>
    %51 = arith.addf %46, %50 : vector<64x128xf32>
    %c0_45 = arith.constant 0 : index
    %c0_46 = arith.constant 0 : index
    %52 = vector.load %arg3[%c0_45, %c0_46] : memref<64x128xf32, #tpu.memory_space<vmem>>, vector<64x128xf32>
    tpu.vector_store %arg3[%c0_45, %c0_46], %51 {strides = array<i32>} : memref<64x128xf32, #tpu.memory_space<vmem>>, vector<64x128xf32>,
    %cst_47 = arith.constant dense<0.000000e+00> : vector<128xf32>
    %53 = vector.multi_reduction <add>, %51, %cst_47 [0] : vector<64x128xf32> to vector<128xf32>
    %54 = vector.shape_cast %53 : vector<128xf32> to vector<1x128xf32>
    %55 = arith.mulf %51, %51 : vector<64x128xf32>
    %cst_48 = arith.constant dense<0.000000e+00> : vector<128xf32>
    %56 = vector.multi_reduction <add>, %55, %cst_48 [0] : vector<64x128xf32> to vector<128xf32>
    %57 = vector.shape_cast %56 : vector<128xf32> to vector<1x128xf32>
    %58 = tpu.concatenate %54, %57 in 0 : vector<1x128xf32>, vector<1x128xf32> -> vector<2x128xf32>
    %c0_49 = arith.constant 0 : index
    %c0_50 = arith.constant 0 : index
    %c0_51 = arith.constant 0 : index
    %59 = vector.load %arg4[%c0_49, %c0_50, %c0_51] : memref<1x2x128xf32, #tpu.memory_space<vmem>>, vector<1x2x128xf32>
    %60 = vector.shape_cast %59 : vector<1x2x128xf32> to vector<2x128xf32>
    %61 = vector.shape_cast %58 : vector<2x128xf32> to vector<1x2x128xf32>
    tpu.vector_store %arg4[%c0_49, %c0_50, %c0_51], %61 {strides = array<i32>} : memref<1x2x128xf32, #tpu.memory_space<vmem>>, vector<1x2x128xf32>,
    return
  }
  func.func @transform_0(%arg0: i32) -> (i32, i32, i32, i32) {
    %c0_i32 = arith.constant 0 : i32
    %c0_i32_0 = arith.constant 0 : i32
    %c0_i32_1 = arith.constant 0 : i32
    %c0_i32_2 = arith.constant 0 : i32
    return %arg0, %c0_i32, %c0_i32_0, %c0_i32_1 : i32, i32, i32, i32
  }
  func.func @transform_1(%arg0: i32) -> (i32, i32, i32, i32) {
    %c0_i32 = arith.constant 0 : i32
    %c0_i32_0 = arith.constant 0 : i32
    %c0_i32_1 = arith.constant 0 : i32
    %c0_i32_2 = arith.constant 0 : i32
    %c0_i32_3 = arith.constant 0 : i32
    return %c0_i32, %c0_i32_0, %c0_i32_1, %c0_i32_2 : i32, i32, i32, i32
  }
  func.func @transform_2(%arg0: i32) -> (i32, i32) {
    %c0_i32 = arith.constant 0 : i32
    %c0_i32_0 = arith.constant 0 : i32
    return %arg0, %c0_i32 : i32, i32
  }
  func.func @transform_3(%arg0: i32) -> (i32, i32, i32) {
    %c0_i32 = arith.constant 0 : i32
    %c0_i32_0 = arith.constant 0 : i32
    %c0_i32_1 = arith.constant 0 : i32
    return %arg0, %c0_i32, %c0_i32_0 : i32, i32, i32
  }
}

module attributes {stable_mosaic.version = 11 : i64} {
  func.func @_maxpool2x2_kernel(%arg0: i32, %arg1: memref<16x2x8x8xf32, #tpu.memory_space<vmem>>, %arg2: memref<16x8x4xf32, #tpu.memory_space<vmem>>) attributes {dimension_semantics = [#tpu.dimension_semantics<parallel>], iteration_bounds = array<i64: 1>, scalar_prefetch = 0 : i64, scratch_operands = 0 : i64, tpu.core_type = #tpu.core_type<tc>, window_params = [{transform_indices = @transform_0, window_bounds = array<i64: 16, 2, 8, 8>}, {transform_indices = @transform_1, window_bounds = array<i64: 16, 8, 4>}]} {
    %c0 = arith.constant 0 : index
    %c0_0 = arith.constant 0 : index
    %c0_1 = arith.constant 0 : index
    %c0_2 = arith.constant 0 : index
    %0 = vector.load %arg1[%c0, %c0_0, %c0_1, %c0_2] : memref<16x2x8x8xf32, #tpu.memory_space<vmem>>, vector<16x2x8x8xf32>
    %1 = vector.extract_strided_slice %0 {offsets = [0, 0, 0, 0], sizes = [16, 1, 8, 8], strides = [1, 1, 1, 1]} : vector<16x2x8x8xf32> to vector<16x1x8x8xf32>
    %2 = vector.shape_cast %1 : vector<16x1x8x8xf32> to vector<16x8x8xf32>
    %3 = vector.extract_strided_slice %0 {offsets = [0, 1, 0, 0], sizes = [16, 1, 8, 8], strides = [1, 1, 1, 1]} : vector<16x2x8x8xf32> to vector<16x1x8x8xf32>
    %4 = vector.shape_cast %3 : vector<16x1x8x8xf32> to vector<16x8x8xf32>
    %5 = arith.maximumf %2, %4 : vector<16x8x8xf32>
    %6 = vector.extract_strided_slice %5 {offsets = [0, 0, 0], sizes = [16, 8, 4], strides = [1, 1, 1]} : vector<16x8x8xf32> to vector<16x8x4xf32>
    %7 = vector.extract_strided_slice %5 {offsets = [0, 0, 4], sizes = [16, 8, 4], strides = [1, 1, 1]} : vector<16x8x8xf32> to vector<16x8x4xf32>
    %8 = arith.maximumf %6, %7 : vector<16x8x4xf32>
    %c0_3 = arith.constant 0 : index
    %c0_4 = arith.constant 0 : index
    %c0_5 = arith.constant 0 : index
    %9 = vector.load %arg2[%c0_3, %c0_4, %c0_5] : memref<16x8x4xf32, #tpu.memory_space<vmem>>, vector<16x8x4xf32>
    tpu.vector_store %arg2[%c0_3, %c0_4, %c0_5], %8 {strides = array<i32>} : memref<16x8x4xf32, #tpu.memory_space<vmem>>, vector<16x8x4xf32>,
    return
  }
  func.func @transform_0(%arg0: i32) -> (i32, i32, i32, i32) {
    %c0_i32 = arith.constant 0 : i32
    %c0_i32_0 = arith.constant 0 : i32
    %c0_i32_1 = arith.constant 0 : i32
    %c0_i32_2 = arith.constant 0 : i32
    return %arg0, %c0_i32, %c0_i32_0, %c0_i32_1 : i32, i32, i32, i32
  }
  func.func @transform_1(%arg0: i32) -> (i32, i32, i32) {
    %c0_i32 = arith.constant 0 : i32
    %c0_i32_0 = arith.constant 0 : i32
    %c0_i32_1 = arith.constant 0 : i32
    return %arg0, %c0_i32, %c0_i32_0 : i32, i32, i32
  }
}

module attributes {stable_mosaic.version = 11 : i64} {
  func.func @_conv3x3_kernel(%arg0: i32, %arg1: memref<1x10x10x128xf32, #tpu.memory_space<vmem>>, %arg2: memref<3x3x128x128xf32, #tpu.memory_space<vmem>>, %arg3: memref<1x128xf32, #tpu.memory_space<vmem>>, %arg4: memref<1x128xf32, #tpu.memory_space<vmem>>, %arg5: memref<64x128xf32, #tpu.memory_space<vmem>>, %arg6: memref<1x2x128xf32, #tpu.memory_space<vmem>>) attributes {dimension_semantics = [#tpu.dimension_semantics<parallel>], iteration_bounds = array<i64: 2>, scalar_prefetch = 0 : i64, scratch_operands = 0 : i64, tpu.core_type = #tpu.core_type<tc>, window_params = [{transform_indices = @transform_0, window_bounds = array<i64: 1, 10, 10, 128>}, {pipeline_mode = #tpu.pipeline_mode<synchronous>, transform_indices = @transform_1, window_bounds = array<i64: 3, 3, 128, 128>}, {pipeline_mode = #tpu.pipeline_mode<synchronous>, transform_indices = @transform_2, window_bounds = array<i64: 1, 128>}, {pipeline_mode = #tpu.pipeline_mode<synchronous>, transform_indices = @transform_3, window_bounds = array<i64: 1, 128>}, {transform_indices = @transform_4, window_bounds = array<i64: 64, 128>}, {transform_indices = @transform_5, window_bounds = array<i64: 1, 2, 128>}]} {
    %c0 = arith.constant 0 : index
    %c0_0 = arith.constant 0 : index
    %c0_1 = arith.constant 0 : index
    %c0_2 = arith.constant 0 : index
    %0 = vector.load %arg1[%c0, %c0_0, %c0_1, %c0_2] : memref<1x10x10x128xf32, #tpu.memory_space<vmem>>, vector<1x10x10x128xf32>
    %1 = vector.shape_cast %0 : vector<1x10x10x128xf32> to vector<10x10x128xf32>
    %c0_3 = arith.constant 0 : index
    %c0_4 = arith.constant 0 : index
    %2 = vector.load %arg3[%c0_3, %c0_4] : memref<1x128xf32, #tpu.memory_space<vmem>>, vector<1x128xf32>
    %3 = vector.shape_cast %2 : vector<1x128xf32> to vector<1x1x128xf32>
    %4 = vector.broadcast %3 : vector<1x1x128xf32> to vector<10x10x128xf32>
    %5 = arith.mulf %1, %4 : vector<10x10x128xf32>
    %c0_5 = arith.constant 0 : index
    %c0_6 = arith.constant 0 : index
    %6 = vector.load %arg4[%c0_5, %c0_6] : memref<1x128xf32, #tpu.memory_space<vmem>>, vector<1x128xf32>
    %7 = vector.shape_cast %6 : vector<1x128xf32> to vector<1x1x128xf32>
    %8 = vector.broadcast %7 : vector<1x1x128xf32> to vector<10x10x128xf32>
    %9 = arith.addf %5, %8 : vector<10x10x128xf32>
    %cst = arith.constant 0.000000e+00 : f32
    %10 = vector.broadcast %cst : f32 to vector<10x10x128xf32>
    %11 = arith.maximumf %9, %10 : vector<10x10x128xf32>
    %c1_i32 = arith.constant 1 : i32
    %c0_i32 = arith.constant 0 : i32
    %12 = arith.cmpi eq, %c1_i32, %c0_i32 : i32
    %c1_i32_7 = arith.constant 1 : i32
    %13 = arith.select %12, %c1_i32_7, %c1_i32 : i32
    %14 = arith.remsi %arg0, %13 : i32
    %c0_i32_8 = arith.constant 0 : i32
    %15 = arith.cmpi ne, %14, %c0_i32_8 : i32
    %c0_i32_9 = arith.constant 0 : i32
    %16 = arith.cmpi slt, %14, %c0_i32_9 : i32
    %c0_i32_10 = arith.constant 0 : i32
    %17 = arith.cmpi slt, %13, %c0_i32_10 : i32
    %18 = arith.xori %16, %17 : i1
    %19 = arith.andi %18, %15 : i1
    %20 = arith.addi %14, %13 : i32
    %21 = arith.select %19, %20, %14 : i32
    %c0_i32_11 = arith.constant 0 : i32
    %22 = arith.cmpi eq, %21, %c0_i32_11 : i32
    %c1_i32_12 = arith.constant 1 : i32
    %c0_i32_13 = arith.constant 0 : i32
    %23 = arith.select %22, %c1_i32_12, %c0_i32_13 : i32
    %c0_i32_14 = arith.constant 0 : i32
    %24 = arith.cmpi eq, %21, %c0_i32_14 : i32
    %c8_i32 = arith.constant 8 : i32
    %c9_i32 = arith.constant 9 : i32
    %25 = arith.select %24, %c8_i32, %c9_i32 : i32
    %26 = tpu.iota {dimensions = array<i32: 0>} : vector<10x10x128xi32>
    %27 = tpu.iota {dimensions = array<i32: 1>} : vector<10x10x128xi32>
    %28 = vector.broadcast %23 : i32 to vector<10x10x128xi32>
    %29 = arith.cmpi sge, %26, %28 : vector<10x10x128xi32>
    %30 = vector.broadcast %25 : i32 to vector<10x10x128xi32>
    %31 = arith.cmpi sle, %26, %30 : vector<10x10x128xi32>
    %32 = arith.andi %29, %31 : vector<10x10x128xi1>
    %c1_i32_15 = arith.constant 1 : i32
    %33 = vector.broadcast %c1_i32_15 : i32 to vector<10x10x128xi32>
    %34 = arith.cmpi sge, %27, %33 : vector<10x10x128xi32>
    %35 = arith.andi %32, %34 : vector<10x10x128xi1>
    %c8_i32_16 = arith.constant 8 : i32
    %36 = vector.broadcast %c8_i32_16 : i32 to vector<10x10x128xi32>
    %37 = arith.cmpi sle, %27, %36 : vector<10x10x128xi32>
    %38 = arith.andi %35, %37 : vector<10x10x128xi1>
    %cst_17 = arith.constant 0.000000e+00 : f32
    %39 = vector.broadcast %cst_17 : f32 to vector<10x10x128xf32>
    %40 = arith.select %38, %11, %39 : vector<10x10x128xi1>, vector<10x10x128xf32>
    %41 = vector.extract_strided_slice %40 {offsets = [0, 0, 0], sizes = [10, 8, 128], strides = [1, 1, 1]} : vector<10x10x128xf32> to vector<10x8x128xf32>
    %42 = vector.shape_cast %41 : vector<10x8x128xf32> to vector<80x128xf32>
    %43 = vector.extract_strided_slice %42 {offsets = [0, 0], sizes = [64, 128], strides = [1, 1]} : vector<80x128xf32> to vector<64x128xf32>
    %c0_18 = arith.constant 0 : index
    %c0_19 = arith.constant 0 : index
    %c0_20 = arith.constant 0 : index
    %c0_21 = arith.constant 0 : index
    %44 = vector.load %arg2[%c0_18, %c0_19, %c0_20, %c0_21] : memref<3x3x128x128xf32, #tpu.memory_space<vmem>>, vector<1x1x128x128xf32>
    %45 = vector.shape_cast %44 : vector<1x1x128x128xf32> to vector<128x128xf32>
    %cst_22 = arith.constant dense<0.000000e+00> : vector<64x128xf32>
    %46 = tpu.matmul %43, %45, %cst_22 {dimension_numbers = #tpu.dot_dimension_numbers<[1], [0], [0], [1], [0, 0, 1, 1], [], []>} : vector<64x128xf32>, vector<128x128xf32>, vector<64x128xf32> -> vector<64x128xf32>
    %47 = vector.extract_strided_slice %42 {offsets = [8, 0], sizes = [64, 128], strides = [1, 1]} : vector<80x128xf32> to vector<64x128xf32>
    %c1 = arith.constant 1 : index
    %c0_23 = arith.constant 0 : index
    %c0_24 = arith.constant 0 : index
    %c0_25 = arith.constant 0 : index
    %48 = vector.load %arg2[%c1, %c0_23, %c0_24, %c0_25] : memref<3x3x128x128xf32, #tpu.memory_space<vmem>>, vector<1x1x128x128xf32>
    %49 = vector.shape_cast %48 : vector<1x1x128x128xf32> to vector<128x128xf32>
    %cst_26 = arith.constant dense<0.000000e+00> : vector<64x128xf32>
    %50 = tpu.matmul %47, %49, %cst_26 {dimension_numbers = #tpu.dot_dimension_numbers<[1], [0], [0], [1], [0, 0, 1, 1], [], []>} : vector<64x128xf32>, vector<128x128xf32>, vector<64x128xf32> -> vector<64x128xf32>
    %51 = arith.addf %46, %50 : vector<64x128xf32>
    %52 = vector.extract_strided_slice %42 {offsets = [16, 0], sizes = [64, 128], strides = [1, 1]} : vector<80x128xf32> to vector<64x128xf32>
    %c2 = arith.constant 2 : index
    %c0_27 = arith.constant 0 : index
    %c0_28 = arith.constant 0 : index
    %c0_29 = arith.constant 0 : index
    %53 = vector.load %arg2[%c2, %c0_27, %c0_28, %c0_29] : memref<3x3x128x128xf32, #tpu.memory_space<vmem>>, vector<1x1x128x128xf32>
    %54 = vector.shape_cast %53 : vector<1x1x128x128xf32> to vector<128x128xf32>
    %cst_30 = arith.constant dense<0.000000e+00> : vector<64x128xf32>
    %55 = tpu.matmul %52, %54, %cst_30 {dimension_numbers = #tpu.dot_dimension_numbers<[1], [0], [0], [1], [0, 0, 1, 1], [], []>} : vector<64x128xf32>, vector<128x128xf32>, vector<64x128xf32> -> vector<64x128xf32>
    %56 = arith.addf %51, %55 : vector<64x128xf32>
    %57 = vector.extract_strided_slice %40 {offsets = [0, 1, 0], sizes = [10, 8, 128], strides = [1, 1, 1]} : vector<10x10x128xf32> to vector<10x8x128xf32>
    %58 = vector.shape_cast %57 : vector<10x8x128xf32> to vector<80x128xf32>
    %59 = vector.extract_strided_slice %58 {offsets = [0, 0], sizes = [64, 128], strides = [1, 1]} : vector<80x128xf32> to vector<64x128xf32>
    %c0_31 = arith.constant 0 : index
    %c1_32 = arith.constant 1 : index
    %c0_33 = arith.constant 0 : index
    %c0_34 = arith.constant 0 : index
    %60 = vector.load %arg2[%c0_31, %c1_32, %c0_33, %c0_34] : memref<3x3x128x128xf32, #tpu.memory_space<vmem>>, vector<1x1x128x128xf32>
    %61 = vector.shape_cast %60 : vector<1x1x128x128xf32> to vector<128x128xf32>
    %cst_35 = arith.constant dense<0.000000e+00> : vector<64x128xf32>
    %62 = tpu.matmul %59, %61, %cst_35 {dimension_numbers = #tpu.dot_dimension_numbers<[1], [0], [0], [1], [0, 0, 1, 1], [], []>} : vector<64x128xf32>, vector<128x128xf32>, vector<64x128xf32> -> vector<64x128xf32>
    %63 = arith.addf %56, %62 : vector<64x128xf32>
    %64 = vector.extract_strided_slice %58 {offsets = [8, 0], sizes = [64, 128], strides = [1, 1]} : vector<80x128xf32> to vector<64x128xf32>
    %c1_36 = arith.constant 1 : index
    %c1_37 = arith.constant 1 : index
    %c0_38 = arith.constant 0 : index
    %c0_39 = arith.constant 0 : index
    %65 = vector.load %arg2[%c1_36, %c1_37, %c0_38, %c0_39] : memref<3x3x128x128xf32, #tpu.memory_space<vmem>>, vector<1x1x128x128xf32>
    %66 = vector.shape_cast %65 : vector<1x1x128x128xf32> to vector<128x128xf32>
    %cst_40 = arith.constant dense<0.000000e+00> : vector<64x128xf32>
    %67 = tpu.matmul %64, %66, %cst_40 {dimension_numbers = #tpu.dot_dimension_numbers<[1], [0], [0], [1], [0, 0, 1, 1], [], []>} : vector<64x128xf32>, vector<128x128xf32>, vector<64x128xf32> -> vector<64x128xf32>
    %68 = arith.addf %63, %67 : vector<64x128xf32>
    %69 = vector.extract_strided_slice %58 {offsets = [16, 0], sizes = [64, 128], strides = [1, 1]} : vector<80x128xf32> to vector<64x128xf32>
    %c2_41 = arith.constant 2 : index
    %c1_42 = arith.constant 1 : index
    %c0_43 = arith.constant 0 : index
    %c0_44 = arith.constant 0 : index
    %70 = vector.load %arg2[%c2_41, %c1_42, %c0_43, %c0_44] : memref<3x3x128x128xf32, #tpu.memory_space<vmem>>, vector<1x1x128x128xf32>
    %71 = vector.shape_cast %70 : vector<1x1x128x128xf32> to vector<128x128xf32>
    %cst_45 = arith.constant dense<0.000000e+00> : vector<64x128xf32>
    %72 = tpu.matmul %69, %71, %cst_45 {dimension_numbers = #tpu.dot_dimension_numbers<[1], [0], [0], [1], [0, 0, 1, 1], [], []>} : vector<64x128xf32>, vector<128x128xf32>, vector<64x128xf32> -> vector<64x128xf32>
    %73 = arith.addf %68, %72 : vector<64x128xf32>
    %74 = vector.extract_strided_slice %40 {offsets = [0, 2, 0], sizes = [10, 8, 128], strides = [1, 1, 1]} : vector<10x10x128xf32> to vector<10x8x128xf32>
    %75 = vector.shape_cast %74 : vector<10x8x128xf32> to vector<80x128xf32>
    %76 = vector.extract_strided_slice %75 {offsets = [0, 0], sizes = [64, 128], strides = [1, 1]} : vector<80x128xf32> to vector<64x128xf32>
    %c0_46 = arith.constant 0 : index
    %c2_47 = arith.constant 2 : index
    %c0_48 = arith.constant 0 : index
    %c0_49 = arith.constant 0 : index
    %77 = vector.load %arg2[%c0_46, %c2_47, %c0_48, %c0_49] : memref<3x3x128x128xf32, #tpu.memory_space<vmem>>, vector<1x1x128x128xf32>
    %78 = vector.shape_cast %77 : vector<1x1x128x128xf32> to vector<128x128xf32>
    %cst_50 = arith.constant dense<0.000000e+00> : vector<64x128xf32>
    %79 = tpu.matmul %76, %78, %cst_50 {dimension_numbers = #tpu.dot_dimension_numbers<[1], [0], [0], [1], [0, 0, 1, 1], [], []>} : vector<64x128xf32>, vector<128x128xf32>, vector<64x128xf32> -> vector<64x128xf32>
    %80 = arith.addf %73, %79 : vector<64x128xf32>
    %81 = vector.extract_strided_slice %75 {offsets = [8, 0], sizes = [64, 128], strides = [1, 1]} : vector<80x128xf32> to vector<64x128xf32>
    %c1_51 = arith.constant 1 : index
    %c2_52 = arith.constant 2 : index
    %c0_53 = arith.constant 0 : index
    %c0_54 = arith.constant 0 : index
    %82 = vector.load %arg2[%c1_51, %c2_52, %c0_53, %c0_54] : memref<3x3x128x128xf32, #tpu.memory_space<vmem>>, vector<1x1x128x128xf32>
    %83 = vector.shape_cast %82 : vector<1x1x128x128xf32> to vector<128x128xf32>
    %cst_55 = arith.constant dense<0.000000e+00> : vector<64x128xf32>
    %84 = tpu.matmul %81, %83, %cst_55 {dimension_numbers = #tpu.dot_dimension_numbers<[1], [0], [0], [1], [0, 0, 1, 1], [], []>} : vector<64x128xf32>, vector<128x128xf32>, vector<64x128xf32> -> vector<64x128xf32>
    %85 = arith.addf %80, %84 : vector<64x128xf32>
    %86 = vector.extract_strided_slice %75 {offsets = [16, 0], sizes = [64, 128], strides = [1, 1]} : vector<80x128xf32> to vector<64x128xf32>
    %c2_56 = arith.constant 2 : index
    %c2_57 = arith.constant 2 : index
    %c0_58 = arith.constant 0 : index
    %c0_59 = arith.constant 0 : index
    %87 = vector.load %arg2[%c2_56, %c2_57, %c0_58, %c0_59] : memref<3x3x128x128xf32, #tpu.memory_space<vmem>>, vector<1x1x128x128xf32>
    %88 = vector.shape_cast %87 : vector<1x1x128x128xf32> to vector<128x128xf32>
    %cst_60 = arith.constant dense<0.000000e+00> : vector<64x128xf32>
    %89 = tpu.matmul %86, %88, %cst_60 {dimension_numbers = #tpu.dot_dimension_numbers<[1], [0], [0], [1], [0, 0, 1, 1], [], []>} : vector<64x128xf32>, vector<128x128xf32>, vector<64x128xf32> -> vector<64x128xf32>
    %90 = arith.addf %85, %89 : vector<64x128xf32>
    %c0_61 = arith.constant 0 : index
    %c0_62 = arith.constant 0 : index
    %91 = vector.load %arg5[%c0_61, %c0_62] : memref<64x128xf32, #tpu.memory_space<vmem>>, vector<64x128xf32>
    tpu.vector_store %arg5[%c0_61, %c0_62], %90 {strides = array<i32>} : memref<64x128xf32, #tpu.memory_space<vmem>>, vector<64x128xf32>,
    %cst_63 = arith.constant dense<0.000000e+00> : vector<128xf32>
    %92 = vector.multi_reduction <add>, %90, %cst_63 [0] : vector<64x128xf32> to vector<128xf32>
    %93 = vector.shape_cast %92 : vector<128xf32> to vector<1x128xf32>
    %94 = arith.mulf %90, %90 : vector<64x128xf32>
    %cst_64 = arith.constant dense<0.000000e+00> : vector<128xf32>
    %95 = vector.multi_reduction <add>, %94, %cst_64 [0] : vector<64x128xf32> to vector<128xf32>
    %96 = vector.shape_cast %95 : vector<128xf32> to vector<1x128xf32>
    %97 = tpu.concatenate %93, %96 in 0 : vector<1x128xf32>, vector<1x128xf32> -> vector<2x128xf32>
    %c0_65 = arith.constant 0 : index
    %c0_66 = arith.constant 0 : index
    %c0_67 = arith.constant 0 : index
    %98 = vector.load %arg6[%c0_65, %c0_66, %c0_67] : memref<1x2x128xf32, #tpu.memory_space<vmem>>, vector<1x2x128xf32>
    %99 = vector.shape_cast %98 : vector<1x2x128xf32> to vector<2x128xf32>
    %100 = vector.shape_cast %97 : vector<2x128xf32> to vector<1x2x128xf32>
    tpu.vector_store %arg6[%c0_65, %c0_66, %c0_67], %100 {strides = array<i32>} : memref<1x2x128xf32, #tpu.memory_space<vmem>>, vector<1x2x128xf32>,
    return
  }
  func.func @transform_0(%arg0: i32) -> (i32, i32, i32, i32) {
    %c0_i32 = arith.constant 0 : i32
    %c0_i32_0 = arith.constant 0 : i32
    %c0_i32_1 = arith.constant 0 : i32
    %c0_i32_2 = arith.constant 0 : i32
    return %arg0, %c0_i32, %c0_i32_0, %c0_i32_1 : i32, i32, i32, i32
  }
  func.func @transform_1(%arg0: i32) -> (i32, i32, i32, i32) {
    %c0_i32 = arith.constant 0 : i32
    %c0_i32_0 = arith.constant 0 : i32
    %c0_i32_1 = arith.constant 0 : i32
    %c0_i32_2 = arith.constant 0 : i32
    %c0_i32_3 = arith.constant 0 : i32
    return %c0_i32, %c0_i32_0, %c0_i32_1, %c0_i32_2 : i32, i32, i32, i32
  }
  func.func @transform_2(%arg0: i32) -> (i32, i32) {
    %c0_i32 = arith.constant 0 : i32
    %c0_i32_0 = arith.constant 0 : i32
    %c0_i32_1 = arith.constant 0 : i32
    return %c0_i32, %c0_i32_0 : i32, i32
  }
  func.func @transform_3(%arg0: i32) -> (i32, i32) {
    %c0_i32 = arith.constant 0 : i32
    %c0_i32_0 = arith.constant 0 : i32
    %c0_i32_1 = arith.constant 0 : i32
    return %c0_i32, %c0_i32_0 : i32, i32
  }
  func.func @transform_4(%arg0: i32) -> (i32, i32) {
    %c0_i32 = arith.constant 0 : i32
    %c0_i32_0 = arith.constant 0 : i32
    return %arg0, %c0_i32 : i32, i32
  }
  func.func @transform_5(%arg0: i32) -> (i32, i32, i32) {
    %c0_i32 = arith.constant 0 : i32
    %c0_i32_0 = arith.constant 0 : i32
    %c0_i32_1 = arith.constant 0 : i32
    return %arg0, %c0_i32, %c0_i32_0 : i32, i32, i32
  }
}

module attributes {stable_mosaic.version = 11 : i64} {
  func.func @_bn_relu_apply_kernel(%arg0: i32, %arg1: memref<128x128xf32, #tpu.memory_space<vmem>>, %arg2: memref<1x128xf32, #tpu.memory_space<vmem>>, %arg3: memref<1x128xf32, #tpu.memory_space<vmem>>, %arg4: memref<128x128xf32, #tpu.memory_space<vmem>>) attributes {dimension_semantics = [#tpu.dimension_semantics<parallel>], iteration_bounds = array<i64: 1>, scalar_prefetch = 0 : i64, scratch_operands = 0 : i64, tpu.core_type = #tpu.core_type<tc>, window_params = [{transform_indices = @transform_0, window_bounds = array<i64: 128, 128>}, {pipeline_mode = #tpu.pipeline_mode<synchronous>, transform_indices = @transform_1, window_bounds = array<i64: 1, 128>}, {pipeline_mode = #tpu.pipeline_mode<synchronous>, transform_indices = @transform_2, window_bounds = array<i64: 1, 128>}, {transform_indices = @transform_3, window_bounds = array<i64: 128, 128>}]} {
    %c0 = arith.constant 0 : index
    %c0_0 = arith.constant 0 : index
    %0 = vector.load %arg1[%c0, %c0_0] : memref<128x128xf32, #tpu.memory_space<vmem>>, vector<128x128xf32>
    %c0_1 = arith.constant 0 : index
    %c0_2 = arith.constant 0 : index
    %1 = vector.load %arg2[%c0_1, %c0_2] : memref<1x128xf32, #tpu.memory_space<vmem>>, vector<1x128xf32>
    %2 = vector.broadcast %1 : vector<1x128xf32> to vector<128x128xf32>
    %3 = arith.mulf %0, %2 : vector<128x128xf32>
    %c0_3 = arith.constant 0 : index
    %c0_4 = arith.constant 0 : index
    %4 = vector.load %arg3[%c0_3, %c0_4] : memref<1x128xf32, #tpu.memory_space<vmem>>, vector<1x128xf32>
    %5 = vector.broadcast %4 : vector<1x128xf32> to vector<128x128xf32>
    %6 = arith.addf %3, %5 : vector<128x128xf32>
    %cst = arith.constant 0.000000e+00 : f32
    %7 = vector.broadcast %cst : f32 to vector<128x128xf32>
    %8 = arith.maximumf %6, %7 : vector<128x128xf32>
    %c0_5 = arith.constant 0 : index
    %c0_6 = arith.constant 0 : index
    %9 = vector.load %arg4[%c0_5, %c0_6] : memref<128x128xf32, #tpu.memory_space<vmem>>, vector<128x128xf32>
    tpu.vector_store %arg4[%c0_5, %c0_6], %8 {strides = array<i32>} : memref<128x128xf32, #tpu.memory_space<vmem>>, vector<128x128xf32>,
    return
  }
  func.func @transform_0(%arg0: i32) -> (i32, i32) {
    %c0_i32 = arith.constant 0 : i32
    %c0_i32_0 = arith.constant 0 : i32
    return %arg0, %c0_i32 : i32, i32
  }
  func.func @transform_1(%arg0: i32) -> (i32, i32) {
    %c0_i32 = arith.constant 0 : i32
    %c0_i32_0 = arith.constant 0 : i32
    %c0_i32_1 = arith.constant 0 : i32
    return %c0_i32, %c0_i32_0 : i32, i32
  }
  func.func @transform_2(%arg0: i32) -> (i32, i32) {
    %c0_i32 = arith.constant 0 : i32
    %c0_i32_0 = arith.constant 0 : i32
    %c0_i32_1 = arith.constant 0 : i32
    return %c0_i32, %c0_i32_0 : i32, i32
  }
  func.func @transform_3(%arg0: i32) -> (i32, i32) {
    %c0_i32 = arith.constant 0 : i32
    %c0_i32_0 = arith.constant 0 : i32
    return %arg0, %c0_i32 : i32, i32
  }
}

</mosaic_0001>

<bundles_post_ra>
// kernel: down_forward.4
= control target key start
LH: loop header
LB: loop body
LE: loop exit
PB: predicated region body
PF: predicated region fallthrough
CT: control target
= control target key end

     0   :  { %s158_s22 = smov 124   ;;  %vm136_vm0 = vcmask 31744   ;;  %s369_s0 = inlined_call_operand.vmem [shape: f32[16,2,8,8], index: 0, kind: input, shape index: {}]   ;;  %s370_s1 = inlined_call_operand.vmem [shape: f32[16,8,4], index: 1, kind: output, shape index: {}]  }
   0x1   :  { %v12_v0 = vld [vmem:[%s369_s0 + $0x20] sm:$0xff]  ;;  %v13_v1 = vld [vmem:[%s369_s0 + $0x28] sm:$0xff]  ;;  %v14_v5 = vld [vmem:[%s369_s0 + $0x30] sm:$0xff] }
   0x2   :  { %v8_v2 = vld [vmem:[%s369_s0] sm:$0xff]  ;;  %v178_v3 = vmax.f32 %v12_v0, %v13_v1  ;;  %v9_v4 = vld [vmem:[%s369_s0 + $0x8] sm:$0xff]  ;;  %v15_v6 = vld [vmem:[%s369_s0 + $0x38] sm:$0xff] }
   0x3   :  { %v189_v7 = vmax.f32 %v8_v2, %v9_v4  ;;  %v10_v8 = vld [vmem:[%s369_s0 + $0x10] sm:$0xff]  ;;  %v11_v9 = vld [vmem:[%s369_s0 + $0x18] sm:$0xff]  ;;  %v199_v10 = vmax.f32 %v14_v5, %v15_v6  ;;  %v16_v14 = vld [vmem:[%s369_s0 + $0x40] sm:$0xff] }
   0x4   :  { %76 = vrot.lane.b32.xlu1 %v178_v3, %s158_s22  ;;  %v203_v11 = vmax.f32 %v10_v8, %v11_v9  ;;  %v18_v12 = vld [vmem:[%s369_s0 + $0x50] sm:$0xff]  ;;  %v19_v13 = vld [vmem:[%s369_s0 + $0x58] sm:$0xff]  ;;  %v17_v15 = vld [vmem:[%s369_s0 + $0x48] sm:$0xff] }
   0x5   :  { %72 = vrot.lane.b32.xlu0 %v189_v7, %s158_s22  ;;  %v219_v16 = vmax.f32 %v18_v12, %v19_v13  ;;  %v223_v17 = vmax.f32 %v16_v14, %v17_v15  ;;  %v22_v18 = vld [vmem:[%s369_s0 + $0x70] sm:$0xff]  ;;  %v23_v19 = vld [vmem:[%s369_s0 + $0x78] sm:$0xff]  ;;  %v20_v20 = vld [vmem:[%s369_s0 + $0x60] sm:$0xff] }
   0x6   :  { %v21_v21 = vld [vmem:[%s369_s0 + $0x68] sm:$0xff]  ;;  %v47_v22 = vmax.f32 %v22_v18, %v23_v19  ;;  %v26_v24 = vld [vmem:[%s369_s0 + $0x90] sm:$0xff]  ;;  %v27_v25 = vld [vmem:[%s369_s0 + $0x98] sm:$0xff] }
   0x7   :  { %v46_v23 = vmax.f32 %v20_v20, %v21_v21  ;;  %v24_v26 = vld [vmem:[%s369_s0 + $0x80] sm:$0xff]  ;;  %v25_v27 = vld [vmem:[%s369_s0 + $0x88] sm:$0xff]  ;;  %v49_v28 = vmax.f32 %v26_v24, %v27_v25  ;;  %v30_v30 = vld [vmem:[%s369_s0 + $0xb0] sm:$0xff] }
   0x8   :  { %78 = vrot.lane.b32.xlu1 %v199_v10, %s158_s22  ;;  %v48_v29 = vmax.f32 %v24_v26, %v25_v27  ;;  %v31_v31 = vld [vmem:[%s369_s0 + $0xb8] sm:$0xff]  ;;  %v28_v32 = vld [vmem:[%s369_s0 + $0xa0] sm:$0xff]  ;;  %v29_v33 = vld [vmem:[%s369_s0 + $0xa8] sm:$0xff] }
   0x9   :  { %74 = vrot.lane.b32.xlu0 %v203_v11, %s158_s22  ;;  %v51_v34 = vmax.f32 %v30_v30, %v31_v31  ;;  %v50_v35 = vmax.f32 %v28_v32, %v29_v33  ;;  %v34_v36 = vld [vmem:[%s369_s0 + $0xd0] sm:$0xff]  ;;  %v35_v37 = vld [vmem:[%s369_s0 + $0xd8] sm:$0xff]  ;;  %v32_v38 = vld [vmem:[%s369_s0 + $0xc0] sm:$0xff] }
   0xa   :  { %v33_v39 = vld [vmem:[%s369_s0 + $0xc8] sm:$0xff]  ;;  %v53_v40 = vmax.f32 %v34_v36, %v35_v37  ;;  %v38_v42 = vld [vmem:[%s369_s0 + $0xf0] sm:$0xff]  ;;  %v39_v43 = vld [vmem:[%s369_s0 + $0xf8] sm:$0xff] }
   0xb   :  { %v52_v41 = vmax.f32 %v32_v38, %v33_v39  ;;  %v36_v44 = vld [vmem:[%s369_s0 + $0xe0] sm:$0xff]  ;;  %v37_v45 = vld [vmem:[%s369_s0 + $0xe8] sm:$0xff]  ;;  %v55_v46 = vmax.f32 %v38_v42, %v39_v43 }
   0xc   :  { %82 = vrot.lane.b32.xlu1 %v219_v16, %s158_s22  ;;  %v54_v47 = vmax.f32 %v36_v44, %v37_v45 }
   0xd   :  { %80 = vrot.lane.b32.xlu0 %v223_v17, %s158_s22 }
  0x10   :  { %86 = vrot.lane.b32.xlu1 %v47_v22, %s158_s22 }
  0x11   :  { %84 = vrot.lane.b32.xlu0 %v46_v23, %s158_s22 }
  0x14   :  { %90 = vrot.lane.b32.xlu1 %v49_v28, %s158_s22 }
  0x15   :  { %88 = vrot.lane.b32.xlu0 %v48_v29, %s158_s22 }
  0x18   :  { %94 = vrot.lane.b32.xlu1 %v51_v34, %s158_s22 }
  0x19   :  { %92 = vrot.lane.b32.xlu0 %v50_v35, %s158_s22 }
  0x1c   :  { %98 = vrot.lane.b32.xlu1 %v53_v40, %s158_s22 }
  0x1d   :  { %96 = vrot.lane.b32.xlu0 %v52_v41, %s158_s22 }
  0x20   :  { %102 = vrot.lane.b32.xlu1 %v55_v46, %s158_s22 }
  0x21   :  { %100 = vrot.lane.b32.xlu0 %v54_v47, %s158_s22 }
  0x76   :  { %v77_v48 = vpop.permute.xlu1 %76 }
  0x77   :  { %v122_v49 = vmax.f32 %v178_v3, %v77_v48  ;;  %v73_v50 = vpop.permute.xlu0 %72 }
  0x78   :  { %v120_v51 = vmax.f32 %v189_v7, %v73_v50 }
  0x79   :  { %139 = vst.msk [vmem:[%s370_s1 + $0x10] sm:$0xff] %vm136_vm0, %v122_v49 }
  0x7a   :  { %137 = vst.msk [vmem:[%s370_s1] sm:$0xff] %vm136_vm0, %v120_v51  ;;  %v79_v52 = vpop.permute.xlu1 %78 }
  0x7b   :  { %v123_v53 = vmax.f32 %v199_v10, %v79_v52  ;;  %v75_v54 = vpop.permute.xlu0 %74 }
  0x7c   :  { %v121_v55 = vmax.f32 %v203_v11, %v75_v54 }
  0x7d   :  { %140 = vst.msk [vmem:[%s370_s1 + $0x18] sm:$0xff] %vm136_vm0, %v123_v53 }
  0x7e   :  { %138 = vst.msk [vmem:[%s370_s1 + $0x8] sm:$0xff] %vm136_vm0, %v121_v55  ;;  %v83_v56 = vpop.permute.xlu1 %82 }
  0x7f   :  { %v125_v57 = vmax.f32 %v219_v16, %v83_v56  ;;  %v81_v58 = vpop.permute.xlu0 %80 }
  0x80   :  { %v124_v59 = vmax.f32 %v223_v17, %v81_v58 }
  0x81   :  { %142 = vst.msk [vmem:[%s370_s1 + $0x28] sm:$0xff] %vm136_vm0, %v125_v57 }
  0x82   :  { %141 = vst.msk [vmem:[%s370_s1 + $0x20] sm:$0xff] %vm136_vm0, %v124_v59  ;;  %v87_v60 = vpop.permute.xlu1 %86 }
  0x83   :  { %v127_v61 = vmax.f32 %v47_v22, %v87_v60  ;;  %v85_v62 = vpop.permute.xlu0 %84 }
  0x84   :  { %v126_v63 = vmax.f32 %v46_v23, %v85_v62 }
  0x85   :  { %144 = vst.msk [vmem:[%s370_s1 + $0x38] sm:$0xff] %vm136_vm0, %v127_v61 }
  0x86   :  { %143 = vst.msk [vmem:[%s370_s1 + $0x30] sm:$0xff] %vm136_vm0, %v126_v63  ;;  %v91_v0 = vpop.permute.xlu1 %90 }
  0x87   :  { %v129_v1 = vmax.f32 %v49_v28, %v91_v0  ;;  %v89_v2 = vpop.permute.xlu0 %88 }
  0x88   :  { %v128_v3 = vmax.f32 %v48_v29, %v89_v2 }
  0x89   :  { %146 = vst.msk [vmem:[%s370_s1 + $0x48] sm:$0xff] %vm136_vm0, %v129_v1 }
  0x8a   :  { %145 = vst.msk [vmem:[%s370_s1 + $0x40] sm:$0xff] %vm136_vm0, %v128_v3  ;;  %v95_v4 = vpop.permute.xlu1 %94 }
  0x8b   :  { %v131_v5 = vmax.f32 %v51_v34, %v95_v4  ;;  %v93_v6 = vpop.permute.xlu0 %92 }
  0x8c   :  { %v130_v7 = vmax.f32 %v50_v35, %v93_v6 }
  0x8d   :  { %148 = vst.msk [vmem:[%s370_s1 + $0x58] sm:$0xff] %vm136_vm0, %v131_v5 }
  0x8e   :  { %147 = vst.msk [vmem:[%s370_s1 + $0x50] sm:$0xff] %vm136_vm0, %v130_v7  ;;  %v99_v8 = vpop.permute.xlu1 %98 }
  0x8f   :  { %v133_v9 = vmax.f32 %v53_v40, %v99_v8  ;;  %v97_v10 = vpop.permute.xlu0 %96 }
  0x90   :  { %v132_v11 = vmax.f32 %v52_v41, %v97_v10 }
  0x91   :  { %150 = vst.msk [vmem:[%s370_s1 + $0x68] sm:$0xff] %vm136_vm0, %v133_v9 }
  0x92   :  { %149 = vst.msk [vmem:[%s370_s1 + $0x60] sm:$0xff] %vm136_vm0, %v132_v11  ;;  %v103_v12 = vpop.permute.xlu1 %102 }
  0x93   :  { %v135_v13 = vmax.f32 %v55_v46, %v103_v12  ;;  %v101_v14 = vpop.permute.xlu0 %100 }
  0x94   :  { %v134_v15 = vmax.f32 %v54_v47, %v101_v14 }
  0x95   :  { %152 = vst.msk [vmem:[%s370_s1 + $0x78] sm:$0xff] %vm136_vm0, %v135_v13 }
  0x96   :  { %151 = vst.msk [vmem:[%s370_s1 + $0x70] sm:$0xff] %vm136_vm0, %v134_v15 }

// kernel: down_forward.7
= control target key start
LH: loop header
LB: loop body
LE: loop exit
PB: predicated region body
PF: predicated region fallthrough
CT: control target
= control target key end

     0   :  { %s254_s0 = inlined_call_operand.vmem [shape: f32[128,128], index: 0, kind: input, shape index: {}]   ;;  %s255_s1 = inlined_call_operand.vmem [shape: f32[1,128], index: 1, kind: input, shape index: {}]   ;;  %s256_s2 = inlined_call_operand.vmem [shape: f32[1,128], index: 2, kind: input, shape index: {}]   ;;  %s257_s3 = inlined_call_operand.vmem [shape: f32[128,128], index: 3, kind: output, shape index: {}]  }
   0x1   :  { %v14_v0 = vld [vmem:[%s254_s0] sm:$0xff]  ;;  %v15_v4 = vld [vmem:[%s254_s0 + $0x8] sm:$0xff]  ;;  %v16_v5 = vld [vmem:[%s254_s0 + $0x10] sm:$0xff] }
   0x2   :  { %v112_v1 = vld [vmem:[%s255_s1] ss:$0 sm:$0xff]  ;;  %v17_v6 = vld [vmem:[%s254_s0 + $0x18] sm:$0xff]  ;;  %v19_v11 = vld [vmem:[%s254_s0 + $0x28] sm:$0xff] }
   0x3   :  { %v143_v2 = vld [vmem:[%s256_s2] ss:$0 sm:$0xff]  ;;  %v37_v3 = vmul.f32 %v112_v1, %v14_v0  ;;  %v38_v7 = vmul.f32 %v112_v1, %v15_v4  ;;  %v39_v8 = vmul.f32 %v112_v1, %v16_v5  ;;  %v40_v9 = vmul.f32 %v112_v1, %v17_v6  ;;  %v20_v12 = vld [vmem:[%s254_s0 + $0x30] sm:$0xff]  ;;  %v21_v17 = vld [vmem:[%s254_s0 + $0x38] sm:$0xff] }
   0x4   :  { %v18_v10 = vld [vmem:[%s254_s0 + $0x20] sm:$0xff]  ;;  %v42_v15 = vmul.f32 %v112_v1, %v19_v11  ;;  %v43_v16 = vmul.f32 %v112_v1, %v20_v12  ;;  %v44_v21 = vmul.f32 %v112_v1, %v21_v17  ;;  %v23_v27 = vld [vmem:[%s254_s0 + $0x48] sm:$0xff]  ;;  %v24_v28 = vld [vmem:[%s254_s0 + $0x50] sm:$0xff] }
   0x5   :  { %v60_v13 = vadd.f32 %v143_v2, %v37_v3  ;;  %v41_v14 = vmul.f32 %v112_v1, %v18_v10  ;;  %v61_v18 = vadd.f32 %v143_v2, %v38_v7  ;;  %v62_v19 = vadd.f32 %v143_v2, %v39_v8  ;;  %v22_v22 = vld [vmem:[%s254_s0 + $0x40] sm:$0xff]  ;;  %v25_v29 = vld [vmem:[%s254_s0 + $0x58] sm:$0xff]  ;;  %v27_v35 = vld [vmem:[%s254_s0 + $0x68] sm:$0xff] }
   0x6   :  { %v63_v20 = vadd.f32 %v143_v2, %v40_v9  ;;  %v65_v25 = vadd.f32 %v143_v2, %v42_v15  ;;  %v66_v26 = vadd.f32 %v143_v2, %v43_v16  ;;  %v67_v33 = vadd.f32 %v143_v2, %v44_v21  ;;  %v26_v34 = vld [vmem:[%s254_s0 + $0x60] sm:$0xff]  ;;  %v28_v36 = vld [vmem:[%s254_s0 + $0x70] sm:$0xff]  ;;  %v29_v41 = vld [vmem:[%s254_s0 + $0x78] sm:$0xff] }
   0x7   :  { %v76_v23 = vmax.f32 %v60_v13, 0.0  ;;  %v64_v24 = vadd.f32 %v143_v2, %v41_v14  ;;  %v77_v30 = vmax.f32 %v61_v18, 0.0  ;;  %v78_v31 = vmax.f32 %v62_v19, 0.0 }
   0x8   :  { %v79_v32 = vmax.f32 %v63_v20, 0.0  ;;  %v81_v38 = vmax.f32 %v65_v25, 0.0  ;;  %v82_v39 = vmax.f32 %v66_v26, 0.0  ;;  %v45_v40 = vmul.f32 %v112_v1, %v22_v22 }
   0x9   :  { %92 = vst [vmem:[%s257_s3] sm:$0xff] %v76_v23  ;;  %v80_v37 = vmax.f32 %v64_v24, 0.0  ;;  %93 = vst [vmem:[%s257_s3 + $0x8] sm:$0xff] %v77_v30  ;;  %v83_v42 = vmax.f32 %v67_v33, 0.0  ;;  %v46_v43 = vmul.f32 %v112_v1, %v23_v27  ;;  %v47_v44 = vmul.f32 %v112_v1, %v24_v28 }
   0xa   :  { %94 = vst [vmem:[%s257_s3 + $0x10] sm:$0xff] %v78_v31  ;;  %95 = vst [vmem:[%s257_s3 + $0x18] sm:$0xff] %v79_v32  ;;  %v48_v45 = vmul.f32 %v112_v1, %v25_v29  ;;  %v68_v46 = vadd.f32 %v143_v2, %v45_v40  ;;  %v49_v47 = vmul.f32 %v112_v1, %v26_v34 }
   0xb   :  { %96 = vst [vmem:[%s257_s3 + $0x20] sm:$0xff] %v80_v37  ;;  %97 = vst [vmem:[%s257_s3 + $0x28] sm:$0xff] %v81_v38  ;;  %v50_v48 = vmul.f32 %v112_v1, %v27_v35  ;;  %v51_v49 = vmul.f32 %v112_v1, %v28_v36  ;;  %v69_v50 = vadd.f32 %v143_v2, %v46_v43 }
   0xc   :  { %98 = vst [vmem:[%s257_s3 + $0x30] sm:$0xff] %v82_v39  ;;  %99 = vst [vmem:[%s257_s3 + $0x38] sm:$0xff] %v83_v42  ;;  %v70_v51 = vadd.f32 %v143_v2, %v47_v44  ;;  %v71_v52 = vadd.f32 %v143_v2, %v48_v45  ;;  %v52_v53 = vmul.f32 %v112_v1, %v29_v41  ;;  %v84_v54 = vmax.f32 %v68_v46, 0.0 }
   0xd   :  { %v72_v55 = vadd.f32 %v143_v2, %v49_v47  ;;  %v73_v56 = vadd.f32 %v143_v2, %v50_v48  ;;  %v74_v57 = vadd.f32 %v143_v2, %v51_v49  ;;  %v85_v58 = vmax.f32 %v69_v50, 0.0 }
   0xe   :  { %v86_v59 = vmax.f32 %v70_v51, 0.0  ;;  %v87_v60 = vmax.f32 %v71_v52, 0.0  ;;  %v75_v61 = vadd.f32 %v143_v2, %v52_v53  ;;  %100 = vst [vmem:[%s257_s3 + $0x40] sm:$0xff] %v84_v54 }
   0xf   :  { %v88_v62 = vmax.f32 %v72_v55, 0.0  ;;  %v89_v63 = vmax.f32 %v73_v56, 0.0  ;;  %v90_v0 = vmax.f32 %v74_v57, 0.0  ;;  %101 = vst [vmem:[%s257_s3 + $0x48] sm:$0xff] %v85_v58 }
  0x10   :  { %102 = vst [vmem:[%s257_s3 + $0x50] sm:$0xff] %v86_v59  ;;  %103 = vst [vmem:[%s257_s3 + $0x58] sm:$0xff] %v87_v60  ;;  %v91_v1 = vmax.f32 %v75_v61, 0.0 }
  0x11   :  { %104 = vst [vmem:[%s257_s3 + $0x60] sm:$0xff] %v88_v62  ;;  %105 = vst [vmem:[%s257_s3 + $0x68] sm:$0xff] %v89_v63 }
  0x12   :  { %106 = vst [vmem:[%s257_s3 + $0x70] sm:$0xff] %v90_v0  ;;  %107 = vst [vmem:[%s257_s3 + $0x78] sm:$0xff] %v91_v1 }

// kernel: down_forward.5
= control target key start
LH: loop header
LB: loop body
LE: loop exit
PB: predicated region body
PF: predicated region fallthrough
CT: control target
= control target key end

     0   :  { %s1870_s12 = smov 0   ;;  %s2191_s0 = inlined_call_operand.vmem [shape: f32[2,10,10,4], index: 0, kind: input, shape index: {}]   ;;  %s2192_s1 = inlined_call_operand.vmem [shape: f32[3,3,4,128], index: 1, kind: input, shape index: {}]   ;;  %s2193_s2 = inlined_call_operand.vmem [shape: f32[128,128], index: 2, kind: output, shape index: {0}]   ;;  %s2194_s3 = inlined_call_operand.vmem [shape: f32[2,2,128], index: 3, kind: output, shape index: {1}]  }
   0x1 LB: > { %s1876_s13 = sadd.s32 4294967295, %s1848_s12   ;;  %p1528_p0 = scmp.ge.s32.totalorder %s1848_s12, 1  ;;  %s1848_s12 = sphi %s1870_s12, %s14_s12  }
   0x2   : > { %p140_p1 = scmp.lt.s32.totalorder %s1848_s12, 3 }
   0x4   : > { %p141_p2 = pnand %p1528_p0, %p140_p1 }
   0x5   : > { %p168_p3 = scmp.lt.s32.totalorder (!%p141_p2), %s1876_s13, 1  ;;  %s1530_s10 = sshll.u32 (!%p141_p2), %s1876_s13, 3 }
   0x6   : > { %144 = sbr.rel (%p141_p2) target bundleno = 306 (0x132), region = 28  ;;  %p174_p4 = scmp.lt.s32.totalorder (!%p141_p2), %s1530_s10, 15 }
   0xb   : > { %v1533_v0 = vld [vmem:[%s2192_s1 + $0xc] sm:$0xf]  ;;  %vm231_vm0 = vcmask 1043456   ;;  %v203_v1 = vld [vmem:[%s2192_s1] sm:$0xf]  ;;  %s1895_s20 = scalar_select %p168_p3, %s1876_s13, 1 }
   0xc   : > { %1831 = vmatprep.subr.msk.mxu1 %vm231_vm0, %v1533_v0  ;;  %1705 = vmatprep.subr.msk.mxu0 %vm231_vm0, %v1533_v0  ;;  %v1552_v2 = vld [vmem:[%s2192_s1 + $0x18] sm:$0xf]  ;;  %vm206_vm1 = vcmask 31744   ;;  %v1562_v9 = vld [vmem:[%s2192_s1 + $0x4] sm:$0xf]  ;;  %vm582_vm2 = vcmask 1046528  }
   0xd   : > { %1832 = vmatpush3.msk.msra.mxu1 %vm231_vm0, %v1533_v0  ;;  %1706 = vmatpush3.msk.msra.mxu0 %vm231_vm0, %v1533_v0  ;;  %s1833_s21 = smul.u32 160, %s1895_s20  ;;  %v1572_v10 = vld [vmem:[%s2192_s1 + $0x10] sm:$0xf]  ;;  %v1582_v14 = vld [vmem:[%s2192_s1 + $0x1c] sm:$0xf]  ;;  %vm987_vm3 = vcmask 1045504  }
   0xe   : > { %1719 = vmatprep.subr.msk.mxu1 %vm231_vm0, %v203_v1  ;;  %1733 = vmatprep.subr.msk.mxu0 %vm231_vm0, %v1552_v2  ;;  %v1592_v15 = vld [vmem:[%s2192_s1 + $0x8] sm:$0xf]  ;;  %v1602_v41 = vld [vmem:[%s2192_s1 + $0x14] sm:$0xf]  ;;  %v1612_v42 = vld [vmem:[%s2192_s1 + $0x20] sm:$0xf] }
   0xf   : > { %s1903_s24 = scalar_lea.vmem %s2191_s0, %s1833_s21  ;;  %s2196_s10 = smov (!%p174_p4, %s1530_s10), 15  ;;  %vm1434_vm4 = vcmask 1040384  }
  0x10   : > { %v1906_v3 = vld [vmem:[%s1903_s24 + $0x10] sm:$0xff]  ;;  %v1912_v5 = vld [vmem:[%s1903_s24 + $0x20] sm:$0xff]  ;;  %v1979_v16 = vld [vmem:[%s1903_s24 + $0x8] sm:$0x3]  ;;  %s1531_s11 = sshll.u32 %s2196_s10, 3  ;;  %s1532_s16 = sshll.u32 %s1895_s20, 1 }
  0x11   : > { %v1909_v4 = vld [vmem:[%s1903_s24 + $0x50] sm:$0xff]  ;;  %1707 = vmatprep.mubr.msk.f32.mxu0 %vm206_vm1, %v1906_v3  ;;  %v1919_v6 = vld [vmem:[%s1903_s24 + $0x60] sm:$0xff]  ;;  %v1982_v17 = vld [vmem:[%s1903_s24 + $0x18] sm:$0x3]  ;;  %v586_v18 = vrot.slane %v1906_v3, 1  ;;  %v584_v20 = vrot.slane %v1979_v16, 1  ;;  %s2171_s15 = scalar_lea.vmem %s2193_s2, %s1531_s11  ;;  %s182_s19 = scalar_lea.vmem %s2194_s3, %s1532_s16 }
  0x12   : > { %1713 = vmatprep.mubr.msk.f32.mxu1 %vm206_vm1, %v1909_v4  ;;  %v1922_v7 = vld [vmem:[%s1903_s24 + $0x30] sm:$0xff]  ;;  %1708 = vmatmul.mubr.msk.f32.vlgmr.msra.gmra.mxu0 %vm206_vm1, %v1912_v5  ;;  %v1940_v11 = vld [vmem:[%s1903_s24 + $0x40] sm:$0xff]  ;;  %v587_v21 = vrot.slane %v1982_v17, 1  ;;  %v1999_v22 = vld [vmem:[%s1903_s24 + $0x28] sm:$0x3]  ;;  %v589_v24 = vrot.slane %v1912_v5, 1 }
  0x13   : > { %v1925_v8 = vld [vmem:[%s1903_s24 + $0x70] sm:$0xff]  ;;  %1714 = vmatmul.mubr.msk.f32.vlgmr.msra.gmra.mxu1 %vm206_vm1, %v1919_v6  ;;  %1734 = vmatpush3.msk.msra.mxu0 %vm231_vm0, %v1552_v2  ;;  %v1943_v12 = vld [vmem:[%s1903_s24 + $0x80] sm:$0xff]  ;;  %v2006_v23 = vld [vmem:[%s1903_s24 + $0x38] sm:$0x3]  ;;  %v590_v26 = vrot.slane %v1999_v22, 1  ;;  %v592_v30 = vrot.slane %v1922_v7, 1 }
  0x14   : > { %1720 = vmatpush3.msk.msra.mxu1 %vm231_vm0, %v203_v1  ;;  %1710 = vmatprep.mubr.msk.f32.mxu0 %vm206_vm1, %v1922_v7  ;;  %v1950_v13 = vld [vmem:[%s1903_s24] sm:$0xff]  ;;  %v2014_v25 = vld [vmem:[%s1903_s24 + $0x90] sm:$0xff]  ;;  %v588_v28 = vsel %vm582_vm2, %v586_v18, %v587_v21  ;;  %v2020_v29 = vld [vmem:[%s1903_s24 + $0x48] sm:$0x3]  ;;  %v593_v31 = vrot.slane %v2006_v23, 1  ;;  %v595_v34 = vrot.slane %v1940_v11, 1 }
  0x15   : > { %1716 = vmatprep.mubr.msk.f32.mxu1 %vm206_vm1, %v1925_v8  ;;  %1747 = vmatprep.subr.msk.mxu1 %vm231_vm0, %v1562_v9  ;;  %v583_v19 = vrot.slane %v1950_v13, 1  ;;  %v2025_v32 = vld [vmem:[%s1903_s24 + $0x58] sm:$0x3]  ;;  %v591_v33 = vsel %vm582_vm2, %v589_v24, %v590_v26  ;;  %v596_v35 = vrot.slane %v2020_v29, 1  ;;  %v598_v36 = vrot.slane %v1909_v4, 1 }
  0x16   : > { %1761 = vmatprep.subr.msk.mxu0 %vm231_vm0, %v1572_v10  ;;  %1711 = vmatmul.mubr.msk.f32.gmra.mxu0 %vm206_vm1, %v1940_v11  ;;  %v599_v37 = vrot.slane %v2025_v32, 1  ;;  %v2039_v38 = vld [vmem:[%s1903_s24 + $0x68] sm:$0x3]  ;;  %v594_v39 = vsel %vm582_vm2, %v592_v30, %v593_v31  ;;  %v2043_v40 = vld [vmem:[%s1903_s24 + $0x78] sm:$0x3]  ;;  %v601_v44 = vrot.slane %v1919_v6, 1 }
  0x17   : > { %1717 = vmatmul.mubr.msk.f32.gmra.mxu1 %vm206_vm1, %v1943_v12  ;;  %1735 = vmatprep.mubr.msk.f32.mxu0 %vm206_vm1, %v1912_v5  ;;  %v585_v27 = vsel %vm582_vm2, %v583_v19, %v584_v20  ;;  %v597_v43 = vsel %vm582_vm2, %v595_v34, %v596_v35  ;;  %v602_v45 = vrot.slane %v2039_v38, 1  ;;  %v604_v47 = vrot.slane %v1925_v8, 1  ;;  %v2064_v49 = vld [vmem:[%s1903_s24 + $0x88] sm:$0x3] }
  0x18   : > { %1721 = vmatprep.mubr.msk.f32.mxu1 %vm206_vm1, %v1950_v13  ;;  %v600_v46 = vsel %vm582_vm2, %v598_v36, %v599_v37  ;;  %v605_v48 = vrot.slane %v2043_v40, 1  ;;  %v607_v50 = vrot.slane %v1943_v12, 1  ;;  %v608_v52 = vrot.slane %v2064_v49, 1 }
  0x19   : > { %v603_v51 = vsel %vm582_vm2, %v601_v44, %v602_v45  ;;  %v988_v53 = vrot.slane %v1950_v13, 2  ;;  %v989_v55 = vrot.slane %v1979_v16, 2  ;;  %v991_v56 = vrot.slane %v1906_v3, 2 }
  0x1a   : > { %1736 = vmatmul.mubr.msk.f32.vlgmr.msra.gmra.mxu0 %vm206_vm1, %v1922_v7  ;;  %v606_v54 = vsel %vm582_vm2, %v604_v47, %v605_v48  ;;  %v992_v57 = vrot.slane %v1982_v17, 2  ;;  %v609_v58 = vsel %vm582_vm2, %v607_v50, %v608_v52  ;;  %v994_v60 = vrot.slane %v1912_v5, 2 }
  0x1b   : > { %1722 = vmatmul.mubr.msk.f32.vlgmr.msra.gmra.mxu1 %vm206_vm1, %v1906_v3  ;;  %1762 = vmatpush3.msk.msra.mxu0 %vm231_vm0, %v1572_v10  ;;  %v990_v59 = vsel %vm987_vm3, %v988_v53, %v989_v55  ;;  %v995_v61 = vrot.slane %v1999_v22, 2  ;;  %v997_v63 = vrot.slane %v1922_v7, 2  ;;  %v998_v0 = vrot.slane %v2006_v23, 2 }
  0x1c   : > { %1748 = vmatpush3.msk.msra.mxu1 %vm231_vm0, %v1562_v9  ;;  %1724 = vmatprep.mubr.msk.f32.mxu1 %vm206_vm1, %v1912_v5  ;;  %v993_v62 = vsel %vm987_vm3, %v991_v56, %v992_v57  ;;  %v1000_v1 = vrot.slane %v1940_v11, 2  ;;  %v1001_v2 = vrot.slane %v2020_v29, 2  ;;  %v1004_v9 = vrot.slane %v2025_v32, 2 }
  0x1d   : > { %1738 = vmatprep.mubr.msk.f32.mxu0 %vm206_vm1, %v1940_v11  ;;  %1775 = vmatprep.subr.msk.mxu1 %vm231_vm0, %v1582_v14  ;;  %v996_v3 = vsel %vm987_vm3, %v994_v60, %v995_v61  ;;  %v999_v5 = vsel %vm987_vm3, %v997_v63, %v998_v0  ;;  %v1007_v13 = vrot.slane %v2039_v38, 2  ;;  %v1009_v17 = vrot.slane %v1925_v8, 2 }
  0x1e   : > { %1789 = vmatprep.subr.msk.mxu0 %vm231_vm0, %v1592_v15  ;;  %1739 = vmatmul.mubr.msk.f32.gmra.mxu0 %vm206_vm1, %v1909_v4  ;;  %v1002_v10 = vsel %vm987_vm3, %v1000_v1, %v1001_v2  ;;  %v1013_v21 = vrot.slane %v2064_v49, 2  ;;  %v1015_v22 = vrot.slane %v2014_v25, 2 }
  0x1f   : > { %1725 = vmatmul.mubr.msk.f32.gmra.mxu1 %vm206_vm1, %v1922_v7  ;;  %1741 = vmatprep.mubr.msk.f32.mxu0 %vm206_vm1, %v1919_v6  ;;  %v1003_v7 = vrot.slane %v1909_v4, 2 }
  0x20   : > { %1727 = vmatprep.mubr.msk.f32.mxu1 %vm206_vm1, %v1940_v11  ;;  %v1006_v11 = vrot.slane %v1919_v6, 2 }
  0x22   : > { %1742 = vmatmul.mubr.msk.f32.gmra.mxu0 %vm206_vm1, %v1925_v8  ;;  %v1008_v18 = vsel %vm987_vm3, %v1006_v11, %v1007_v13 }
  0x23   : > { %1728 = vmatmul.mubr.msk.f32.gmra.mxu1 %vm206_vm1, %v1909_v4  ;;  %1744 = vmatprep.mubr.msk.f32.mxu0 %vm206_vm1, %v1943_v12  ;;  %v1005_v4 = vsel %vm987_vm3, %v1003_v7, %v1004_v9 }
  0x24   : > { %1730 = vmatprep.mubr.msk.f32.mxu1 %vm206_vm1, %v1919_v6  ;;  %v1010_v6 = vrot.slane %v2043_v40, 2 }
  0x26   : > { %1745 = vmatmul.mubr.msk.f32.gmra.mxu0 %vm206_vm1, %v2014_v25  ;;  %v1011_v20 = vsel %vm987_vm3, %v1009_v17, %v1010_v6 }
  0x27   : > { %1731 = vmatmul.mubr.msk.f32.gmra.mxu1 %vm206_vm1, %v1925_v8  ;;  %1763 = vmatprep.mubr.msk.f32.mxu0 %vm206_vm1, %v588_v28  ;;  %v1012_v8 = vrot.slane %v1943_v12, 2 }
  0x28   : > { %1749 = vmatprep.mubr.msk.f32.mxu1 %vm206_vm1, %v585_v27 }
  0x29   : > { %v1014_v24 = vsel %vm987_vm3, %v1012_v8, %v1013_v21 }
  0x2a   : > { %1764 = vmatmul.mubr.msk.f32.vlgmr.msra.gmra.mxu0 %vm206_vm1, %v591_v33 }
  0x2b   : > { %1750 = vmatmul.mubr.msk.f32.vlgmr.msra.gmra.mxu1 %vm206_vm1, %v588_v28  ;;  %1790 = vmatpush3.msk.msra.mxu0 %vm231_vm0, %v1592_v15  ;;  %v610_v15 = vrot.slane %v2014_v25, 1 }
  0x2c   : > { %1776 = vmatpush3.msk.msra.mxu1 %vm231_vm0, %v1582_v14  ;;  %1752 = vmatprep.mubr.msk.f32.mxu1 %vm206_vm1, %v591_v33  ;;  %v202_v14 = vld [vmem:[%s1903_s24 + $0x98] sm:$0x3] }
  0x2d   : > { %1766 = vmatprep.mubr.msk.f32.mxu0 %vm206_vm1, %v594_v39  ;;  %1803 = vmatprep.subr.msk.mxu1 %vm231_vm0, %v1602_v41  ;;  %v611_v16 = vrot.slane %v202_v14, 1  ;;  %v1016_v23 = vrot.slane %v202_v14, 2 }
  0x2e   : > { %1817 = vmatprep.subr.msk.mxu0 %vm231_vm0, %v1612_v42  ;;  %1767 = vmatmul.mubr.msk.f32.gmra.mxu0 %vm206_vm1, %v597_v43 }
  0x2f   : > { %1753 = vmatmul.mubr.msk.f32.gmra.mxu1 %vm206_vm1, %v594_v39  ;;  %1769 = vmatprep.mubr.msk.f32.mxu0 %vm206_vm1, %v600_v46  ;;  %v612_v19 = vsel %vm582_vm2, %v610_v15, %v611_v16  ;;  %v1017_v12 = vsel %vm987_vm3, %v1015_v22, %v1016_v23 }
  0x30   : > { %1755 = vmatprep.mubr.msk.f32.mxu1 %vm206_vm1, %v597_v43 }
  0x32   : > { %1770 = vmatmul.mubr.msk.f32.gmra.mxu0 %vm206_vm1, %v603_v51 }
  0x33   : > { %1756 = vmatmul.mubr.msk.f32.gmra.mxu1 %vm206_vm1, %v600_v46  ;;  %1772 = vmatprep.mubr.msk.f32.mxu0 %vm206_vm1, %v606_v54 }
  0x34   : > { %1758 = vmatprep.mubr.msk.f32.mxu1 %vm206_vm1, %v603_v51 }
  0x36   : > { %1773 = vmatmul.mubr.msk.f32.gmra.mxu0 %vm206_vm1, %v609_v58 }
  0x37   : > { %1759 = vmatmul.mubr.msk.f32.gmra.mxu1 %vm206_vm1, %v606_v54  ;;  %1791 = vmatprep.mubr.msk.f32.mxu0 %vm206_vm1, %v990_v59 }
  0x38   : > { %1777 = vmatprep.mubr.msk.f32.mxu1 %vm206_vm1, %v591_v33 }
  0x3a   : > { %1792 = vmatmul.mubr.msk.f32.vlgmr.msra.gmra.mxu0 %vm206_vm1, %v993_v62 }
  0x3b   : > { %1778 = vmatmul.mubr.msk.f32.vlgmr.msra.gmra.mxu1 %vm206_vm1, %v594_v39  ;;  %1818 = vmatpush3.msk.msra.mxu0 %vm231_vm0, %v1612_v42 }
  0x3c   : > { %1804 = vmatpush3.msk.msra.mxu1 %vm231_vm0, %v1602_v41  ;;  %1780 = vmatprep.mubr.msk.f32.mxu1 %vm206_vm1, %v597_v43 }
  0x3d   : > { %1794 = vmatprep.mubr.msk.f32.mxu0 %vm206_vm1, %v996_v3 }
  0x3e   : > { %1795 = vmatmul.mubr.msk.f32.gmra.mxu0 %vm206_vm1, %v999_v5 }
  0x3f   : > { %1781 = vmatmul.mubr.msk.f32.gmra.mxu1 %vm206_vm1, %v600_v46  ;;  %1797 = vmatprep.mubr.msk.f32.mxu0 %vm206_vm1, %v1002_v10 }
  0x40   : > { %1783 = vmatprep.mubr.msk.f32.mxu1 %vm206_vm1, %v603_v51 }
  0x42   : > { %1798 = vmatmul.mubr.msk.f32.gmra.mxu0 %vm206_vm1, %v1005_v4 }
  0x43   : > { %1784 = vmatmul.mubr.msk.f32.gmra.mxu1 %vm206_vm1, %v606_v54  ;;  %1800 = vmatprep.mubr.msk.f32.mxu0 %vm206_vm1, %v1008_v18 }
  0x44   : > { %1786 = vmatprep.mubr.msk.f32.mxu1 %vm206_vm1, %v609_v58 }
  0x46   : > { %1801 = vmatmul.mubr.msk.f32.gmra.mxu0 %vm206_vm1, %v1011_v20 }
  0x47   : > { %1787 = vmatmul.mubr.msk.f32.gmra.mxu1 %vm206_vm1, %v612_v19  ;;  %1819 = vmatprep.mubr.msk.f32.mxu0 %vm206_vm1, %v996_v3 }
  0x48   : > { %1805 = vmatprep.mubr.msk.f32.mxu1 %vm206_vm1, %v993_v62 }
  0x4a   : > { %1820 = vmatmul.mubr.msk.f32.vlgmr.msra.gmra.mxu0 %vm206_vm1, %v999_v5 }
  0x4b   : > { %1806 = vmatmul.mubr.msk.f32.vlgmr.msra.gmra.mxu1 %vm206_vm1, %v996_v3  ;;  %1822 = vmatprep.mubr.msk.f32.mxu0 %vm206_vm1, %v1002_v10 }
  0x4c   : > { %1808 = vmatprep.mubr.msk.f32.mxu1 %vm206_vm1, %v999_v5 }
  0x4e   : > { %1823 = vmatmul.mubr.msk.f32.gmra.mxu0 %vm206_vm1, %v1005_v4 }
  0x4f   : > { %1809 = vmatmul.mubr.msk.f32.gmra.mxu1 %vm206_vm1, %v1002_v10  ;;  %1825 = vmatprep.mubr.msk.f32.mxu0 %vm206_vm1, %v1008_v18 }
  0x50   : > { %1811 = vmatprep.mubr.msk.f32.mxu1 %vm206_vm1, %v1005_v4 }
  0x52   : > { %1826 = vmatmul.mubr.msk.f32.gmra.mxu0 %vm206_vm1, %v1011_v20 }
  0x53   : > { %1812 = vmatmul.mubr.msk.f32.gmra.mxu1 %vm206_vm1, %v1008_v18  ;;  %1828 = vmatprep.mubr.msk.f32.mxu0 %vm206_vm1, %v1014_v24 }
  0x54   : > { %1814 = vmatprep.mubr.msk.f32.mxu1 %vm206_vm1, %v1011_v20 }
  0x56   : > { %1829 = vmatmul.mubr.msk.f32.gmra.mxu0 %vm206_vm1, %v1017_v12 }
  0x57   : > { %1815 = vmatmul.mubr.msk.f32.gmra.mxu1 %vm206_vm1, %v1014_v24 }
  0xd2   : > { %v1709_v25 = vpop.f32.mrf.mxu0 }
  0xd3   : > { %v1715_v26 = vpop.f32.mrf.mxu1 }
  0xd4   : > { %v301_v27 = vpop.f32.mrf.mxu0 }
  0xd5   : > { %v321_v28 = vpop.f32.mrf.mxu1 }
  0xd6   : > { %v1712_v29 = vpop.f32.mrf.mxu0 }
  0xd7   : > { %v2149_v30 = vpop.f32.mrf.mxu1 }
  0xd8   : > { %v311_v31 = vpop.f32.mrf.mxu0 }
  0xd9   : > { %v2151_v32 = vpop.f32.mrf.mxu1 }
  0xda   : > { %v1737_v34 = vpop.f32.mrf.mxu0 }
  0xdb   : > { %v1723_v33 = vpop.f32.mrf.mxu1 }
  0xdc   : > { %v525_v36 = vpop.f32.mrf.mxu0  ;;  %v418_v1 = vadd.f32 %v1723_v33, %v1709_v25 }
  0xdd   : > { %v412_v35 = vpop.f32.mrf.mxu1 }
  0xde   : > { %v1740_v38 = vpop.f32.mrf.mxu0  ;;  %v413_v5 = vadd.f32 %v412_v35, %v301_v27  ;;  %v565_v10 = vadd.f32 %v1737_v34, %v418_v1 }
  0xdf   : > { %v1726_v37 = vpop.f32.mrf.mxu1 }
  0xe0   : > { %v535_v40 = vpop.f32.mrf.mxu0  ;;  %v428_v11 = vadd.f32 %v1726_v37, %v1712_v29  ;;  %v564_v15 = vadd.f32 %v525_v36, %v413_v5 }
  0xe1   : > { %v422_v39 = vpop.f32.mrf.mxu1 }
  0xe2   : > { %v1743_v42 = vpop.f32.mrf.mxu0  ;;  %v423_v4 = vadd.f32 %v422_v39, %v311_v31  ;;  %v567_v18 = vadd.f32 %v1740_v38, %v428_v11 }
  0xe3   : > { %v1729_v41 = vpop.f32.mrf.mxu1 }
  0xe4   : > { %v545_v44 = vpop.f32.mrf.mxu0  ;;  %v438_v19 = vadd.f32 %v1729_v41, %v1715_v26  ;;  %v566_v23 = vadd.f32 %v535_v40, %v423_v4 }
  0xe5   : > { %v432_v43 = vpop.f32.mrf.mxu1 }
  0xe6   : > { %v2153_v46 = vpop.f32.mrf.mxu0  ;;  %v433_v8 = vadd.f32 %v432_v43, %v321_v28  ;;  %v569_v29 = vadd.f32 %v1743_v42, %v438_v19 }
  0xe7   : > { %v1732_v45 = vpop.f32.mrf.mxu1 }
  0xe8   : > { %v2155_v48 = vpop.f32.mrf.mxu0  ;;  %v568_v31 = vadd.f32 %v545_v44, %v433_v8  ;;  %v448_v36 = vadd.f32 %v1732_v45, %v2149_v30 }
  0xe9   : > { %v442_v47 = vpop.f32.mrf.mxu1 }
  0xea   : > { %v1765_v50 = vpop.f32.mrf.mxu0  ;;  %v443_v26 = vadd.f32 %v442_v47, %v2151_v32 }
  0xeb   : > { %v1751_v49 = vpop.f32.mrf.mxu1 }
  0xec   : > { %v820_v52 = vpop.f32.mrf.mxu0  ;;  %v740_v16 = vadd.f32 %v1751_v49, %v565_v10  ;;  %v570_v44 = vadd.f32 %v2155_v48, %v443_v26 }
  0xed   : > { %v700_v51 = vpop.f32.mrf.mxu1 }
  0xee   : > { %v1768_v54 = vpop.f32.mrf.mxu0  ;;  %v739_v20 = vadd.f32 %v700_v51, %v564_v15  ;;  %v860_v24 = vadd.f32 %v1765_v50, %v740_v16 }
  0xef   : > { %v1754_v53 = vpop.f32.mrf.mxu1 }
  0xf0   : > { %v830_v56 = vpop.f32.mrf.mxu0  ;;  %v742_v12 = vadd.f32 %v1754_v53, %v567_v18  ;;  %v859_v33 = vadd.f32 %v820_v52, %v739_v20  ;;  %v571_v52 = vadd.f32 %v2153_v46, %v448_v36 }
  0xf1   : > { %v710_v55 = vpop.f32.mrf.mxu1 }
  0xf2   : > { %v1771_v58 = vpop.f32.mrf.mxu0  ;;  %v741_v34 = vadd.f32 %v710_v55, %v566_v23  ;;  %v862_v28 = vadd.f32 %v1768_v54, %v742_v12 }
  0xf3   : > { %v1757_v57 = vpop.f32.mrf.mxu1 }
  0xf4   : > { %v840_v60 = vpop.f32.mrf.mxu0  ;;  %v744_v39 = vadd.f32 %v1757_v57, %v569_v29  ;;  %v861_v50 = vadd.f32 %v830_v56, %v741_v34 }
  0xf5   : > { %v720_v59 = vpop.f32.mrf.mxu1 }
  0xf6   : > { %v2157_v62 = vpop.f32.mrf.mxu0  ;;  %v743_v41 = vadd.f32 %v720_v59, %v568_v31  ;;  %v864_v32 = vadd.f32 %v1771_v58, %v744_v39 }
  0xf7   : > { %v1760_v61 = vpop.f32.mrf.mxu1 }
  0xf8   : > { %v2159_v0 = vpop.f32.mrf.mxu0  ;;  %v863_v54 = vadd.f32 %v840_v60, %v743_v41  ;;  %v746_v57 = vadd.f32 %v1760_v61, %v571_v52 }
  0xf9   : > { %v730_v63 = vpop.f32.mrf.mxu1 }
  0xfa   : > { %v1793_v3 = vpop.f32.mrf.mxu0  ;;  %v745_v1 = vadd.f32 %v730_v63, %v570_v44  ;;  %v866_v63 = vadd.f32 %v2157_v62, %v746_v57 }
  0xfb   : > { %v1779_v2 = vpop.f32.mrf.mxu1 }
  0xfc   : > { %v1105_v9 = vpop.f32.mrf.mxu0  ;;  %v980_v35 = vadd.f32 %v1779_v2, %v860_v24  ;;  %v865_v10 = vadd.f32 %v2159_v0, %v745_v1 }
  0xfd   : > { %v940_v7 = vpop.f32.mrf.mxu1 }
  0xfe   : > { %v1796_v14 = vpop.f32.mrf.mxu0  ;;  %v979_v40 = vadd.f32 %v940_v7, %v859_v33  ;;  %v1145_v42 = vadd.f32 %v1793_v3, %v980_v35 }
  0xff   : > { %v1782_v13 = vpop.f32.mrf.mxu1 }
 0x100   : > { %v1115_v6 = vpop.f32.mrf.mxu0  ;;  %v982_v51 = vadd.f32 %v1782_v13, %v862_v28  ;;  %v1144_v47 = vadd.f32 %v1105_v9, %v979_v40 }
 0x101   : > { %v950_v17 = vpop.f32.mrf.mxu1 }
 0x102   : > { %v1799_v22 = vpop.f32.mrf.mxu0  ;;  %v981_v53 = vadd.f32 %v950_v17, %v861_v50  ;;  %v1147_v46 = vadd.f32 %v1796_v14, %v982_v51 }
 0x103   : > { %v1785_v21 = vpop.f32.mrf.mxu1 }
 0x104   : > { %v1125_v27 = vpop.f32.mrf.mxu0  ;;  %v984_v48 = vadd.f32 %v1785_v21, %v864_v32  ;;  %v1146_v7 = vadd.f32 %v1115_v6, %v981_v53 }
 0x105   : > { %v960_v25 = vpop.f32.mrf.mxu1 }
 0x106   : > { %v2164_v38 = vpop.f32.mrf.mxu0  ;;  %v983_v9 = vadd.f32 %v960_v25, %v863_v54  ;;  %v1149_v15 = vadd.f32 %v1799_v22, %v984_v48 }
 0x107   : > { %v1788_v37 = vpop.f32.mrf.mxu1 }
 0x108   : > { %v1135_v49 = vpop.f32.mrf.mxu0  ;;  %v986_v17 = vadd.f32 %v1788_v37, %v866_v63  ;;  %v1148_v8 = vadd.f32 %v1125_v27, %v983_v9 }
 0x109   : > { %v970_v43 = vpop.f32.mrf.mxu1 }
 0x10a   : > { %v1821_v45 = vpop.f32.mrf.mxu0  ;;  %v985_v18 = vadd.f32 %v970_v43, %v865_v10  ;;  %v1151_v34 = vadd.f32 %v2164_v38, %v986_v17 }
 0x10b   : > { %v1807_v30 = vpop.f32.mrf.mxu1 }
 0x10c   : > { %v1265_v55 = vadd.f32 %v1807_v30, %v1145_v42  ;;  %v1345_v59 = vpop.f32.mrf.mxu0  ;;  %v1150_v35 = vadd.f32 %v1135_v49, %v985_v18 }
 0x10d   : > { %v1225_v56 = vpop.f32.mrf.mxu1 }
 0x10e   : > { %v1385_v2 = vadd.f32 %v1821_v45, %v1265_v55  ;;  %v1264_v3 = vadd.f32 %v1225_v56, %v1144_v47  ;;  %v1824_v5 = vpop.f32.mrf.mxu0 }
 0x10f   : > { %v1810_v58 = vpop.f32.mrf.mxu1 }
 0x110   : > { %1393 = vst [vmem:[%s2171_s15 + $0x8] sm:$0xff] %v1385_v2  ;;  %v1384_v60 = vadd.f32 %v1345_v59, %v1264_v3  ;;  %v1267_v61 = vadd.f32 %v1810_v58, %v1147_v46  ;;  %v1355_v13 = vpop.f32.mrf.mxu0  ;;  %v1414_v6 = vmul.f32 %v1385_v2, %v1385_v2 }
 0x111   : > { %v1235_v11 = vpop.f32.mrf.mxu1 }
 0x112   : > { %1392 = vst [vmem:[%s2171_s15] sm:$0xff] %v1384_v60  ;;  %v1413_v14 = vmul.f32 %v1384_v60, %v1384_v60  ;;  %v1387_v4 = vadd.f32 %v1824_v5, %v1267_v61  ;;  %v1266_v16 = vadd.f32 %v1235_v11, %v1146_v7  ;;  %v1827_v20 = vpop.f32.mrf.mxu0  ;;  %v1400_v21 = vadd.f32 %v1385_v2, %v1384_v60 }
 0x113   : > { %v1813_v19 = vpop.f32.mrf.mxu1 }
 0x114   : > { %1395 = vst [vmem:[%s2171_s15 + $0x18] sm:$0xff] %v1387_v4  ;;  %v1386_v62 = vadd.f32 %v1355_v13, %v1266_v16  ;;  %v1269_v23 = vadd.f32 %v1813_v19, %v1149_v15  ;;  %v1421_v0 = vadd.f32 %v1414_v6, %v1413_v14  ;;  %v1365_v12 = vpop.f32.mrf.mxu0  ;;  %v1416_v27 = vmul.f32 %v1387_v4, %v1387_v4 }
 0x115   : > { %v1245_v24 = vpop.f32.mrf.mxu1 }
 0x116   : > { %1394 = vst [vmem:[%s2171_s15 + $0x10] sm:$0xff] %v1386_v62  ;;  %v1401_v22 = vadd.f32 %v1400_v21, %v1386_v62  ;;  %v1415_v25 = vmul.f32 %v1386_v62, %v1386_v62  ;;  %v1389_v29 = vadd.f32 %v1827_v20, %v1269_v23  ;;  %v1268_v33 = vadd.f32 %v1245_v24, %v1148_v8  ;;  %v1830_v36 = vpop.f32.mrf.mxu0 }
 0x117   : > { %v1816_v31 = vpop.f32.mrf.mxu1 }
 0x118   : > { %v1422_v26 = vadd.f32 %v1421_v0, %v1415_v25  ;;  %1397 = vst [vmem:[%s2171_s15 + $0x28] sm:$0xff] %v1389_v29  ;;  %v1388_v37 = vadd.f32 %v1365_v12, %v1268_v33  ;;  %v1402_v28 = vadd.f32 %v1401_v22, %v1387_v4  ;;  %v1271_v39 = vadd.f32 %v1816_v31, %v1151_v34  ;;  %v1375_v52 = vpop.f32.mrf.mxu0 }
 0x119   : > { %v1255_v40 = vpop.f32.mrf.mxu1  ;;  %v1418_v38 = vmul.f32 %v1389_v29, %v1389_v29 }
 0x11a   : > { %1396 = vst [vmem:[%s2171_s15 + $0x20] sm:$0xff] %v1388_v37  ;;  %v1403_v41 = vadd.f32 %v1402_v28, %v1388_v37  ;;  %v1417_v43 = vmul.f32 %v1388_v37, %v1388_v37  ;;  %v1423_v50 = vadd.f32 %v1422_v26, %v1416_v27  ;;  %v1270_v42 = vadd.f32 %v1255_v40, %v1150_v35 }
 0x11b   : > { %v1391_v51 = vadd.f32 %v1830_v36, %v1271_v39 }
 0x11c   : > { %v1424_v49 = vadd.f32 %v1423_v50, %v1417_v43  ;;  %v1390_v44 = vadd.f32 %v1375_v52, %v1270_v42  ;;  %v1404_v30 = vadd.f32 %v1403_v41, %v1389_v29 }
 0x11d   : > { %1399 = vst [vmem:[%s2171_s15 + $0x38] sm:$0xff] %v1391_v51  ;;  %v1420_v53 = vmul.f32 %v1391_v51, %v1391_v51 }
 0x11e   : > { %1398 = vst [vmem:[%s2171_s15 + $0x30] sm:$0xff] %v1390_v44  ;;  %v1405_v45 = vadd.f32 %v1404_v30, %v1390_v44  ;;  %v1419_v32 = vmul.f32 %v1390_v44, %v1390_v44  ;;  %v1425_v47 = vadd.f32 %v1424_v49, %v1418_v38 }
 0x120   : > { %v1406_v55 = vadd.f32 %v1405_v45, %v1391_v51  ;;  %v1426_v54 = vadd.f32 %v1425_v47, %v1419_v32 }
 0x122   : > { %v1407_v57 = vrot.slane %v1406_v55, 4  ;;  %v1427_v1 = vadd.f32 %v1426_v54, %v1420_v53 }
 0x124   : > { %v1408_v56 = vadd.f32 %v1407_v57, %v1406_v55  ;;  %v1428_v59 = vrot.slane %v1427_v1, 4 }
 0x126   : > { %v1409_v46 = vrot.slane %v1408_v56, 2  ;;  %v1429_v48 = vadd.f32 %v1428_v59, %v1427_v1 }
 0x128   : > { %v1410_v2 = vadd.f32 %v1409_v46, %v1408_v56  ;;  %v1430_v3 = vrot.slane %v1429_v48, 2 }
 0x12a   : > { %v1411_v58 = vrot.slane %v1410_v2, 1  ;;  %v1431_v5 = vadd.f32 %v1430_v3, %v1429_v48 }
 0x12c   : > { %v1432_v7 = vrot.slane %v1431_v5, 1  ;;  %v1412_v9 = vadd.f32 %v1411_v58, %v1410_v2 }
 0x12e   : > { %v1433_v60 = vadd.f32 %v1432_v7, %v1431_v5 }
 0x130   : > { %v1435_v61 = vsel %vm1434_vm4, %v1412_v9, %v1433_v60 }
 0x131   : > { %1436 = vst [vmem:[%s182_s19] sm:$0x3] %v1435_v61 }
 0x132 PF: > { %s14_s12 = sadd.s32 1, %s1848_s12  }
 0x133   : > { %p11_p5 = scmp.ge.s32.totalorder %s14_s12, 4  }
 0x135   :  { %13 = sbr.rel (!%p11_p5) target bundleno = 1 (0x1), region = 78 }

// kernel: down_forward.6
= control target key start
LH: loop header
LB: loop body
LE: loop exit
PB: predicated region body
PF: predicated region fallthrough
CT: control target
= control target key end

     0   :  { %s2609_s18 = smov 0   ;;  %s3459_s0 = inlined_call_operand.vmem [shape: f32[2,10,10,128], index: 0, kind: input, shape index: {}]   ;;  %s3460_s1 = inlined_call_operand.vmem [shape: f32[3,3,128,128], index: 1, kind: input, shape index: {}]   ;;  %s3461_s2 = inlined_call_operand.vmem [shape: f32[1,128], index: 2, kind: input, shape index: {}]   ;;  %s3462_s3 = inlined_call_operand.vmem [shape: f32[1,128], index: 3, kind: input, shape index: {}]   ;;  %s3463_s4 = inlined_call_operand.vmem [shape: f32[128,128], index: 4, kind: output, shape index: {0}]   ;;  %s3464_s5 = inlined_call_operand.vmem [shape: f32[2,2,128], index: 5, kind: output, shape index: {1}]  }
   0x1 LB: > { %s2615_s19 = sadd.s32 4294967295, %s2576_s18   ;;  %p1757_p0 = scmp.ge.s32.totalorder %s2576_s18, 1  ;;  %s2576_s18 = sphi %s2609_s18, %s16_s18  }
   0x2   : > { %p190_p1 = scmp.lt.s32.totalorder %s2576_s18, 3 }
   0x4   : > { %p191_p2 = pnand %p1757_p0, %p190_p1 }
   0x6   : > { %194 = sbr.rel (%p191_p2) target bundleno = 434 (0x1b2), region = 36 }
   0xb   : > { %v1779_v0 = vld [vmem:[%s3460_s1 + $0x1f8] sm:$0xff]  ;;  %v1778_v2 = vld [vmem:[%s3460_s1 + $0x1f0] sm:$0xff]  ;;  %v1777_v4 = vld [vmem:[%s3460_s1 + $0x1e8] sm:$0xff]  ;;  %p222_p3 = scmp.lt.s32.totalorder %s2615_s19, 1  ;;  %v331_v24 = vlaneseq  ;;  %vm1190_vm2 = vcmask 1045504   ;;  %vm759_vm3 = vcmask 1046528  }
   0xc   : > { %v381_v1 = vld [vmem:[%s3460_s1 + $0x78] sm:$0xff]  ;;  %2132 = vmatprep.subr.mxu0 %v1779_v0  ;;  %v380_v3 = vld [vmem:[%s3460_s1 + $0x70] sm:$0xff]  ;;  %v379_v5 = vld [vmem:[%s3460_s1 + $0x68] sm:$0xff]  ;;  %s1759_s7 = sshll.u32 %s2615_s19, 3  ;;  %vm1663_vm4 = vcmask 1040384  }
   0xd   : > { %2176 = vmatprep.subr.mxu1 %v381_v1  ;;  %2133 = vmatpush3.msra.mxu0 %v1779_v0  ;;  %v1776_v6 = vld [vmem:[%s3460_s1 + $0x1e0] sm:$0xff]  ;;  %v1775_v8 = vld [vmem:[%s3460_s1 + $0x1d8] sm:$0xff]  ;;  %s2651_s15 = scalar_select %p222_p3, %s2615_s19, 1  ;;  %v1774_v10 = vld [vmem:[%s3460_s1 + $0x1d0] sm:$0xff]  ;;  %v2721_v33 = vshrl.u32 %v331_v24, 7 }
   0xe   : > { %2177 = vmatpush3.msra.mxu1 %v381_v1  ;;  %2134 = vmatprep.subr.mxu0 %v1778_v2  ;;  %v378_v7 = vld [vmem:[%s3460_s1 + $0x60] sm:$0xff]  ;;  %v377_v9 = vld [vmem:[%s3460_s1 + $0x58] sm:$0xff]  ;;  %v376_v11 = vld [vmem:[%s3460_s1 + $0x50] sm:$0xff]  ;;  %p228_p4 = scmp.lt.s32.totalorder %s1759_s7, 15 }
   0xf   : > { %2178 = vmatprep.subr.mxu1 %v380_v3  ;;  %2135 = vmatpush3.msra.mxu0 %v1778_v2  ;;  %v1773_v12 = vld [vmem:[%s3460_s1 + $0x1c8] sm:$0xff]  ;;  %s2560_s26 = smul.u32 160, %s2651_s15  ;;  %v1772_v14 = vld [vmem:[%s3460_s1 + $0x1c0] sm:$0xff]  ;;  %v1771_v16 = vld [vmem:[%s3460_s1 + $0x1b8] sm:$0xff]  ;;  %v2735_v41 = vadd.s32 8, %v2721_v33  ;;  %vm334_vm0 = vcmp.ge.s32.totalorder %v2721_v33, 1 }
  0x10   : > { %2179 = vmatpush3.msra.mxu1 %v380_v3  ;;  %2136 = vmatprep.subr.mxu0 %v1777_v4  ;;  %v375_v13 = vld [vmem:[%s3460_s1 + $0x48] sm:$0xff]  ;;  %v374_v15 = vld [vmem:[%s3460_s1 + $0x40] sm:$0xff]  ;;  %v373_v17 = vld [vmem:[%s3460_s1 + $0x38] sm:$0xff]  ;;  %s3482_s7 = smov (!%p228_p4, %s1759_s7), 15  ;;  %s1761_s11 = sshll.u32 %s2651_s15, 1 }
  0x11   : > { %2180 = vmatprep.subr.mxu1 %v379_v5  ;;  %2137 = vmatpush3.msra.mxu0 %v1777_v4  ;;  %s2681_s12 = scalar_lea.vmem %s3459_s0, %s2560_s26  ;;  %v1770_v18 = vld [vmem:[%s3460_s1 + $0x1b0] sm:$0xff]  ;;  %v2693_v21 = vld [vmem:[%s3461_s2] ss:$0 sm:$0xff]  ;;  %v1769_v22 = vld [vmem:[%s3460_s1 + $0x1a8] sm:$0xff]  ;;  %vm341_vm1 = vcmp.le.s32.totalorder %v2735_v41, 8  ;;  %s1760_s19 = sshll.u32 %s3482_s7, 3 }
  0x12   : > { %2181 = vmatpush3.msra.mxu1 %v379_v5  ;;  %2138 = vmatprep.subr.mxu0 %v1776_v6  ;;  %v372_v19 = vld [vmem:[%s3460_s1 + $0x30] sm:$0xff]  ;;  %v371_v23 = vld [vmem:[%s3460_s1 + $0x28] sm:$0xff]  ;;  %v241_v25 = vld [vmem:[%s2681_s12 + $0x20] sm:$0xff]  ;;  %s3440_s10 = scalar_lea.vmem %s3463_s4, %s1760_s19  ;;  %s236_s16 = scalar_lea.vmem %s3464_s5, %s1761_s11 }
  0x13   : > { %2182 = vmatprep.subr.mxu1 %v378_v7  ;;  %2139 = vmatpush3.msra.mxu0 %v1776_v6  ;;  %v239_v20 = vld [vmem:[%s2681_s12 + $0x10] sm:$0xff]  ;;  %v1768_v26 = vld [vmem:[%s3460_s1 + $0x1a0] sm:$0xff]  ;;  %v1767_v30 = vld [vmem:[%s3460_s1 + $0x198] sm:$0xff]  ;;  %v268_v32 = vmul.f32 %v2693_v21, %v241_v25 }
  0x14   : > { %2183 = vmatpush3.msra.mxu1 %v378_v7  ;;  %2140 = vmatprep.subr.mxu0 %v1775_v8  ;;  %v370_v27 = vld [vmem:[%s3460_s1 + $0x20] sm:$0xff]  ;;  %v266_v28 = vmul.f32 %v2693_v21, %v239_v20  ;;  %v369_v31 = vld [vmem:[%s3460_s1 + $0x18] sm:$0xff]  ;;  %v1766_v34 = vld [vmem:[%s3460_s1 + $0x190] sm:$0xff] }
  0x15   : > { %2184 = vmatprep.subr.mxu1 %v377_v9  ;;  %2141 = vmatpush3.msra.mxu0 %v1775_v8  ;;  %v2712_v29 = vld [vmem:[%s3462_s3] ss:$0 sm:$0xff]  ;;  %v368_v35 = vld [vmem:[%s3460_s1 + $0x10] sm:$0xff]  ;;  %v240_v40 = vld [vmem:[%s2681_s12 + $0x18] sm:$0x3] }
  0x16   : > { %2185 = vmatpush3.msra.mxu1 %v377_v9  ;;  %2142 = vmatprep.subr.mxu0 %v1774_v10  ;;  %v293_v36 = vadd.f32 %v2712_v29, %v266_v28  ;;  %v243_v37 = vld [vmem:[%s2681_s12 + $0x30] sm:$0xff]  ;;  %v245_v38 = vld [vmem:[%s2681_s12 + $0x40] sm:$0xff]  ;;  %v1765_v42 = vld [vmem:[%s3460_s1 + $0x188] sm:$0xff]  ;;  %v295_v44 = vadd.f32 %v2712_v29, %v268_v32  ;;  %v267_v46 = vmul.f32 %v2693_v21, %v240_v40 }
  0x17   : > { %2186 = vmatprep.subr.mxu1 %v376_v11  ;;  %2143 = vmatpush3.msra.mxu0 %v1774_v10  ;;  %v247_v39 = vld [vmem:[%s2681_s12 + $0x50] sm:$0xff]  ;;  %v367_v43 = vld [vmem:[%s3460_s1 + $0x8] sm:$0xff]  ;;  %v249_v45 = vld [vmem:[%s2681_s12 + $0x60] sm:$0xff]  ;;  %v270_v47 = vmul.f32 %v2693_v21, %v243_v37  ;;  %v272_v53 = vmul.f32 %v2693_v21, %v245_v38 }
  0x18   : > { %2187 = vmatpush3.msra.mxu1 %v376_v11  ;;  %2144 = vmatprep.subr.mxu0 %v1773_v12  ;;  %v242_v48 = vld [vmem:[%s2681_s12 + $0x28] sm:$0x3]  ;;  %v244_v49 = vld [vmem:[%s2681_s12 + $0x38] sm:$0x3]  ;;  %v1764_v50 = vld [vmem:[%s3460_s1 + $0x180] sm:$0xff]  ;;  %v313_v52 = vmax.f32 %v293_v36, 0.0  ;;  %v274_v54 = vmul.f32 %v2693_v21, %v247_v39  ;;  %v276_v57 = vmul.f32 %v2693_v21, %v249_v45  ;;  %v294_v62 = vadd.f32 %v2712_v29, %v267_v46 }
  0x19   : > { %2188 = vmatprep.subr.mxu1 %v375_v13  ;;  %2145 = vmatpush3.msra.mxu0 %v1773_v12  ;;  %v366_v51 = vld [vmem:[%s3460_s1] sm:$0xff]  ;;  %v251_v55 = vld [vmem:[%s2681_s12 + $0x70] sm:$0xff]  ;;  %v269_v56 = vmul.f32 %v2693_v21, %v242_v48  ;;  %v271_v58 = vmul.f32 %v2693_v21, %v244_v49  ;;  %v246_v59 = vld [vmem:[%s2681_s12 + $0x48] sm:$0x3]  ;;  %v2765_v61 = vmax.f32 %v295_v44, 0.0  ;;  %v297_v2 = vadd.f32 %v2712_v29, %v270_v47 }
  0x1a   : > { %2189 = vmatpush3.msra.mxu1 %v375_v13  ;;  %2146 = vmatprep.subr.mxu0 %v1772_v14  ;;  %v248_v60 = vld [vmem:[%s2681_s12 + $0x58] sm:$0x3]  ;;  %v273_v0 = vmul.f32 %v2693_v21, %v246_v59  ;;  %v2772_v1 = vsel %vm334_vm0, %v313_v52, 0.0  ;;  %v278_v3 = vmul.f32 %v2693_v21, %v251_v55  ;;  %v250_v5 = vld [vmem:[%s2681_s12 + $0x68] sm:$0x3]  ;;  %v299_v8 = vadd.f32 %v2712_v29, %v272_v53  ;;  %v1807_v40 = vld [vmem:[%s3460_s1 + $0x360] sm:$0xff] }
  0x1b   : > { %2190 = vmatprep.subr.mxu1 %v374_v15  ;;  %2147 = vmatpush3.msra.mxu0 %v1772_v14  ;;  %v296_v63 = vadd.f32 %v2712_v29, %v269_v56  ;;  %v275_v4 = vmul.f32 %v2693_v21, %v248_v60  ;;  %v1810_v6 = vld [vmem:[%s3460_s1 + $0x378] sm:$0xff]  ;;  %v301_v9 = vadd.f32 %v2712_v29, %v274_v54  ;;  %v2791_v11 = vsel %vm334_vm0, %v2765_v61, 0.0 }
  0x1c   : > { %2191 = vmatpush3.msra.mxu1 %v374_v15  ;;  %2148 = vmatprep.subr.mxu0 %v1771_v16  ;;  %v1833_v7 = vld [vmem:[%s3460_s1 + $0xf8] sm:$0xff]  ;;  %v1194_v13 = vrot.slane %v2772_v1, 2  ;;  %v2578_v14 = vmov 0.0   ;;  %v298_v15 = vadd.f32 %v2712_v29, %v271_v58  ;;  %v303_v20 = vadd.f32 %v2712_v29, %v276_v57 }
  0x1d   : > { %2192 = vmatprep.subr.mxu1 %v373_v17  ;;  %2149 = vmatpush3.msra.mxu0 %v1771_v16  ;;  %v316_v10 = vmax.f32 %v296_v63, 0.0  ;;  %v252_v12 = vld [vmem:[%s2681_s12 + $0x78] sm:$0x3]  ;;  %v300_v16 = vadd.f32 %v2712_v29, %v273_v0  ;;  %v2813_v25 = vmax.f32 %v297_v2, 0.0  ;;  %v1197_v28 = vrot.slane %v2791_v11, 2  ;;  %v1828_v63 = vld [vmem:[%s3460_s1 + $0xd0] sm:$0xff] }
  0x1e   : > { %2193 = vmatpush3.msra.mxu1 %v373_v17  ;;  %2150 = vmatprep.subr.mxu0 %v1770_v18  ;;  %v277_v17 = vmul.f32 %v2693_v21, %v250_v5  ;;  %v279_v24 = vmul.f32 %v2693_v21, %v252_v12  ;;  %v2827_v32 = vmax.f32 %v299_v8, 0.0  ;;  %v2832_v37 = vmax.f32 %v301_v9, 0.0  ;;  %v1827_v12 = vld [vmem:[%s3460_s1 + $0xc8] sm:$0xff] }
  0x1f   : > { %2194 = vmatprep.subr.mxu1 %v372_v19  ;;  %2151 = vmatpush3.msra.mxu0 %v1770_v18  ;;  %v1809_v18 = vld [vmem:[%s3460_s1 + $0x370] sm:$0xff]  ;;  %v318_v38 = vmax.f32 %v298_v15, 0.0  ;;  %v320_v39 = vmax.f32 %v300_v16, 0.0  ;;  %v2849_v45 = vsel %vm334_vm0, %v2813_v25, 0.0 }
  0x20   : > { %2195 = vmatpush3.msra.mxu1 %v372_v19  ;;  %2152 = vmatprep.subr.mxu0 %v1769_v22  ;;  %v1832_v19 = vld [vmem:[%s3460_s1 + $0xf0] sm:$0xff]  ;;  %v306_v36 = vadd.f32 %v2712_v29, %v279_v24  ;;  %v2863_v53 = vsel %vm334_vm0, %v2827_v32, 0.0  ;;  %v2868_v54 = vsel %vm334_vm0, %v2832_v37, 0.0  ;;  %v1200_v2 = vrot.slane %v2849_v45, 2  ;;  %v1826_v24 = vld [vmem:[%s3460_s1 + $0xc0] sm:$0xff] }
  0x21   : > { %2196 = vmatprep.subr.mxu1 %v371_v23  ;;  %2153 = vmatpush3.msra.mxu0 %v1769_v22  ;;  %v314_v22 = vmax.f32 %v294_v62, 0.0  ;;  %v2880_v57 = vsel %vm341_vm1, %v318_v38, 0.0  ;;  %v2884_v58 = vsel %vm341_vm1, %v320_v39, 0.0  ;;  %v1805_v62 = vld [vmem:[%s3460_s1 + $0x350] sm:$0xff]  ;;  %v1206_v9 = vrot.slane %v2868_v54, 2  ;;  %v253_v39 = vld [vmem:[%s2681_s12 + $0x80] sm:$0xff] }
  0x22   : > { %2197 = vmatpush3.msra.mxu1 %v371_v23  ;;  %2154 = vmatprep.subr.mxu0 %v1768_v26  ;;  %v302_v23 = vadd.f32 %v2712_v29, %v275_v4  ;;  %v326_v49 = vmax.f32 %v306_v36, 0.0  ;;  %v1203_v4 = vrot.slane %v2863_v53, 2  ;;  %v1204_v8 = vrot.slane %v2884_v58, 2  ;;  %v1801_v36 = vld [vmem:[%s3460_s1 + $0x330] sm:$0xff] }
  0x23   : > { %2198 = vmatprep.subr.mxu1 %v370_v27  ;;  %2155 = vmatpush3.msra.mxu0 %v1768_v26  ;;  %v305_v26 = vadd.f32 %v2712_v29, %v278_v3  ;;  %v2844_v44 = vsel %vm341_vm1, %v314_v22, 0.0  ;;  %v1201_v3 = vrot.slane %v2880_v57, 2  ;;  %v1824_v38 = vld [vmem:[%s3460_s1 + $0xb0] sm:$0xff] }
  0x24   : > { %2199 = vmatpush3.msra.mxu1 %v370_v27  ;;  %2156 = vmatprep.subr.mxu0 %v1767_v30  ;;  %v2818_v27 = vsel %vm341_vm1, %v316_v10, 0.0  ;;  %v322_v46 = vmax.f32 %v302_v23, 0.0  ;;  %v1804_v10 = vld [vmem:[%s3460_s1 + $0x348] sm:$0xff]  ;;  %v1803_v23 = vld [vmem:[%s3460_s1 + $0x340] sm:$0xff] }
  0x25   : > { %2200 = vmatprep.subr.mxu1 %v369_v31  ;;  %2157 = vmatpush3.msra.mxu0 %v1767_v30  ;;  %v1808_v30 = vld [vmem:[%s3460_s1 + $0x368] sm:$0xff]  ;;  %v2851_v47 = vmax.f32 %v305_v26, 0.0  ;;  %v2928_v15 = vsel %vm1190_vm2, %v1200_v2, %v1201_v3  ;;  %v763_v3 = vrot.slane %v2772_v1, 1  ;;  %v1849_v1 = vld [vmem:[%s3460_s1 + $0x278] sm:$0xff] }
  0x26   : > { %2201 = vmatpush3.msra.mxu1 %v369_v31  ;;  %2158 = vmatprep.subr.mxu0 %v1766_v34  ;;  %v1831_v31 = vld [vmem:[%s3460_s1 + $0xe8] sm:$0xff]  ;;  %v2904_v0 = vsel %vm341_vm1, %v322_v46, 0.0  ;;  %v280_v46 = vmul.f32 %v2693_v21, %v253_v39  ;;  %v1858_v39 = vld [vmem:[%s3460_s1 + $0x3c0] sm:$0xff] }
  0x27   : > { %2202 = vmatprep.subr.mxu1 %v368_v35  ;;  %2159 = vmatpush3.msra.mxu0 %v1766_v34  ;;  %v1198_v34 = vrot.slane %v2818_v27, 2  ;;  %v2889_v59 = vsel %vm334_vm0, %v2851_v47, 0.0  ;;  %v1207_v16 = vrot.slane %v2904_v0, 2  ;;  %v1819_v2 = vld [vmem:[%s3460_s1 + $0x88] sm:$0xff] }
  0x28   : > { %2203 = vmatpush3.msra.mxu1 %v368_v35  ;;  %2160 = vmatprep.subr.mxu0 %v1765_v42  ;;  %v304_v35 = vadd.f32 %v2712_v29, %v277_v17 }
  0x29   : > { %2204 = vmatprep.subr.mxu1 %v367_v43  ;;  %2161 = vmatpush3.msra.mxu0 %v1765_v42  ;;  %v1830_v42 = vld [vmem:[%s3460_s1 + $0xe0] sm:$0xff]  ;;  %v2876_v56 = vsel %vm1190_vm2, %v1197_v28, %v1198_v34  ;;  %v2948_v28 = vsel %vm1190_vm2, %v1206_v9, %v1207_v16  ;;  %v1802_v34 = vld [vmem:[%s3460_s1 + $0x338] sm:$0xff]  ;;  %v3048_v9 = vrot.slane %v2578_v14, 1  ;;  %v767_v16 = vrot.slane %v2818_v27, 1 }
  0x2a   : > { %2205 = vmatpush3.msra.mxu1 %v367_v43  ;;  %2162 = vmatprep.subr.mxu0 %v1764_v50  ;;  %v2840_v43 = vmax.f32 %v303_v20, 0.0  ;;  %v324_v48 = vmax.f32 %v304_v35, 0.0  ;;  %v1212_v20 = vrot.slane %v2889_v59, 2  ;;  %v1825_v35 = vld [vmem:[%s3460_s1 + $0xb8] sm:$0xff] }
  0x2b   : > { %2206 = vmatprep.subr.mxu1 %v366_v51  ;;  %2163 = vmatpush3.msra.mxu0 %v1764_v50  ;;  %v1195_v50 = vrot.slane %v2844_v44, 2 }
  0x2c   : > { %2164 = vmatprep.mubr.msk.f32.mxu0 %vm334_vm0, %v313_v52  ;;  %2207 = vmatpush3.msra.mxu1 %v366_v51  ;;  %v1806_v51 = vld [vmem:[%s3460_s1 + $0x358] sm:$0xff]  ;;  %v2873_v55 = vsel %vm334_vm0, %v2840_v43, 0.0  ;;  %v2911_v5 = vsel %vm341_vm1, %v324_v48, 0.0  ;;  %v1799_v48 = vld [vmem:[%s3460_s1 + $0x320] sm:$0xff] }
  0x2d   : > { %2208 = vmatprep.mubr.f32.mxu1 %v2578_v14  ;;  %2165 = vmatmul.mubr.msk.f32.vlgmr.msra.gmra.mxu0 %vm334_vm0, %v2765_v61  ;;  %v2894_v60 = vsel %vm1190_vm2, %v1194_v13, %v1195_v50  ;;  %v1209_v17 = vrot.slane %v2873_v55, 2  ;;  %v1798_v50 = vld [vmem:[%s3460_s1 + $0x318] sm:$0xff] }
  0x2e   : > { %2209 = vmatmul.mubr.msk.f32.vlgmr.msra.gmra.mxu1 %vm334_vm0, %v313_v52  ;;  %2220 = vmatprep.subr.mxu0 %v1810_v6  ;;  %v1829_v52 = vld [vmem:[%s3460_s1 + $0xd8] sm:$0xff] }
  0x2f   : > { %2264 = vmatprep.subr.mxu1 %v1833_v7  ;;  %2221 = vmatpush3.msra.mxu0 %v1810_v6  ;;  %v2915_v6 = vsel %vm341_vm1, %v326_v49, 0.0  ;;  %v1822_v49 = vld [vmem:[%s3460_s1 + $0xa0] sm:$0xff] }
  0x30   : > { %2265 = vmatpush3.msra.mxu1 %v1833_v7  ;;  %2222 = vmatprep.subr.mxu0 %v1809_v18  ;;  %v254_v7 = vld [vmem:[%s2681_s12 + $0x88] sm:$0x3]  ;;  %v1213_v22 = vrot.slane %v2915_v6, 2 }
  0x31   : > { %2266 = vmatprep.subr.mxu1 %v1832_v19  ;;  %2223 = vmatpush3.msra.mxu0 %v1809_v18  ;;  %v281_v13 = vmul.f32 %v2693_v21, %v254_v7  ;;  %v2933_v18 = vsel %vm1190_vm2, %v1203_v4, %v1204_v8  ;;  %v307_v21 = vadd.f32 %v2712_v29, %v280_v46  ;;  %v1795_v4 = vld [vmem:[%s3460_s1 + $0x300] sm:$0xff]  ;;  %v764_v8 = vrot.slane %v2844_v44, 1  ;;  %v1865_v44 = vld [vmem:[%s3460_s1 + $0x3f8] sm:$0xff]  ;;  %v1840_v46 = vld [vmem:[%s3460_s1 + $0x230] sm:$0xff] }
  0x32   : > { %2267 = vmatpush3.msra.mxu1 %v1832_v19  ;;  %2224 = vmatprep.subr.mxu0 %v1808_v30  ;;  %v1210_v19 = vrot.slane %v2911_v5, 2  ;;  %v1818_v7 = vld [vmem:[%s3460_s1 + $0x80] sm:$0xff] }
  0x33   : > { %2268 = vmatprep.subr.mxu1 %v1831_v31  ;;  %2225 = vmatpush3.msra.mxu0 %v1808_v30  ;;  %v2945_v26 = vadd.f32 %v2712_v29, %v281_v13  ;;  %v1797_v29 = vld [vmem:[%s3460_s1 + $0x310] sm:$0xff]  ;;  %v766_v13 = vrot.slane %v2791_v11, 1  ;;  %v1863_v11 = vld [vmem:[%s3460_s1 + $0x3e8] sm:$0xff] }
  0x34   : > { %2269 = vmatpush3.msra.mxu1 %v1831_v31  ;;  %2226 = vmatprep.subr.mxu0 %v1807_v40  ;;  %v2951_v30 = vsel %vm1190_vm2, %v1209_v17, %v1210_v19  ;;  %v2954_v31 = vsel %vm1190_vm2, %v1212_v20, %v1213_v22  ;;  %v770_v17 = vrot.slane %v2880_v57, 1  ;;  %v1847_v19 = vld [vmem:[%s3460_s1 + $0x268] sm:$0xff]  ;;  %v772_v20 = vrot.slane %v2863_v53, 1  ;;  %v1861_v53 = vld [vmem:[%s3460_s1 + $0x3d8] sm:$0xff] }
  0x35   : > { %2270 = vmatprep.subr.mxu1 %v1830_v42  ;;  %2227 = vmatpush3.msra.mxu0 %v1807_v40  ;;  %v1800_v40 = vld [vmem:[%s3460_s1 + $0x328] sm:$0xff]  ;;  %v3087_v27 = vsel %vm759_vm3, %v766_v13, %v767_v16  ;;  %v773_v22 = vrot.slane %v2884_v58, 1  ;;  %v1844_v58 = vld [vmem:[%s3460_s1 + $0x250] sm:$0xff]  ;;  %v328_v16 = vmax.f32 %v2945_v26, 0.0 }
  0x36   : > { %2271 = vmatpush3.msra.mxu1 %v1830_v42  ;;  %2228 = vmatprep.subr.mxu0 %v1806_v51  ;;  %v1823_v42 = vld [vmem:[%s3460_s1 + $0xa8] sm:$0xff] }
  0x37   : > { %2272 = vmatprep.subr.mxu1 %v1829_v52  ;;  %2229 = vmatpush3.msra.mxu0 %v1806_v51  ;;  %v1821_v51 = vld [vmem:[%s3460_s1 + $0x98] sm:$0xff]  ;;  %v1895_v13 = vld [vmem:[%s3460_s1 + $0x2e8] sm:$0xff] }
  0x38   : > { %2273 = vmatpush3.msra.mxu1 %v1829_v52  ;;  %2230 = vmatprep.subr.mxu0 %v1805_v62  ;;  %v1820_v52 = vld [vmem:[%s3460_s1 + $0x90] sm:$0xff] }
  0x39   : > { %2274 = vmatprep.subr.mxu1 %v1828_v63  ;;  %2231 = vmatpush3.msra.mxu0 %v1805_v62  ;;  %v3019_v62 = vmax.f32 %v307_v21, 0.0  ;;  %v1855_v21 = vld [vmem:[%s3460_s1 + $0x3a8] sm:$0xff] }
  0x3a   : > { %2275 = vmatpush3.msra.mxu1 %v1828_v63  ;;  %2232 = vmatprep.subr.mxu0 %v1804_v10  ;;  %v1796_v63 = vld [vmem:[%s3460_s1 + $0x308] sm:$0xff] }
  0x3b   : > { %2276 = vmatprep.subr.mxu1 %v1827_v12  ;;  %2233 = vmatpush3.msra.mxu0 %v1804_v10  ;;  %v3060_v10 = vsel %vm759_vm3, %v763_v3, %v764_v8  ;;  %v1835_v3 = vld [vmem:[%s3460_s1 + $0x208] sm:$0xff]  ;;  %v1850_v8 = vld [vmem:[%s3460_s1 + $0x380] sm:$0xff]  ;;  %v3244_v26 = vsel %vm334_vm0, %v3019_v62, 0.0 }
  0x3c   : > { %2277 = vmatpush3.msra.mxu1 %v1827_v12  ;;  %2234 = vmatprep.subr.mxu0 %v1803_v23  ;;  %v1848_v12 = vld [vmem:[%s3460_s1 + $0x270] sm:$0xff]  ;;  %v784_v33 = vrot.slane %v3244_v26, 1 }
  0x3d   : > { %2278 = vmatprep.subr.mxu1 %v1826_v24  ;;  %2235 = vmatpush3.msra.mxu0 %v1803_v23  ;;  %v776_v23 = vrot.slane %v2904_v0, 1 }
  0x3e   : > { %2279 = vmatpush3.msra.mxu1 %v1826_v24  ;;  %2236 = vmatprep.subr.mxu0 %v1802_v34  ;;  %v1845_v24 = vld [vmem:[%s3460_s1 + $0x258] sm:$0xff] }
  0x3f   : > { %2280 = vmatprep.subr.mxu1 %v1825_v35  ;;  %2237 = vmatpush3.msra.mxu0 %v1802_v34  ;;  %v778_v34 = vrot.slane %v2873_v55, 1  ;;  %v1859_v55 = vld [vmem:[%s3460_s1 + $0x3c8] sm:$0xff] }
  0x40   : > { %2281 = vmatpush3.msra.mxu1 %v1825_v35  ;;  %2167 = vmatprep.mubr.msk.f32.mxu0 %vm334_vm0, %v2813_v25  ;;  %v779_v35 = vrot.slane %v2911_v5, 1  ;;  %v1842_v5 = vld [vmem:[%s3460_s1 + $0x240] sm:$0xff] }
  0x41   : > { %2211 = vmatprep.mubr.msk.f32.mxu1 %vm334_vm0, %v2765_v61  ;;  %2238 = vmatprep.subr.mxu0 %v1801_v36 }
  0x42   : > { %2282 = vmatprep.subr.mxu1 %v1824_v38  ;;  %2168 = vmatmul.mubr.msk.f32.gmra.mxu0 %vm334_vm0, %v2827_v32 }
  0x43   : > { %2212 = vmatmul.mubr.msk.f32.gmra.mxu1 %vm334_vm0, %v2813_v25  ;;  %2239 = vmatpush3.msra.mxu0 %v1801_v36  ;;  %v782_v36 = vrot.slane %v2915_v6, 1 }
  0x44   : > { %2283 = vmatpush3.msra.mxu1 %v1824_v38  ;;  %2240 = vmatprep.subr.mxu0 %v1800_v40  ;;  %v1843_v38 = vld [vmem:[%s3460_s1 + $0x248] sm:$0xff] }
  0x45   : > { %2284 = vmatprep.subr.mxu1 %v1823_v42  ;;  %2241 = vmatpush3.msra.mxu0 %v1800_v40  ;;  %v1841_v40 = vld [vmem:[%s3460_s1 + $0x238] sm:$0xff] }
  0x46   : > { %2285 = vmatpush3.msra.mxu1 %v1823_v42  ;;  %2170 = vmatprep.mubr.msk.f32.mxu0 %vm334_vm0, %v2832_v37  ;;  %v1857_v42 = vld [vmem:[%s3460_s1 + $0x3b8] sm:$0xff] }
  0x47   : > { %2214 = vmatprep.mubr.msk.f32.mxu1 %vm334_vm0, %v2827_v32  ;;  %2242 = vmatprep.subr.mxu0 %v1799_v48 }
  0x48   : > { %2286 = vmatprep.subr.mxu1 %v1822_v49  ;;  %2171 = vmatmul.mubr.msk.f32.gmra.mxu0 %vm334_vm0, %v2840_v43 }
  0x49   : > { %2215 = vmatmul.mubr.msk.f32.gmra.mxu1 %vm334_vm0, %v2832_v37  ;;  %2243 = vmatpush3.msra.mxu0 %v1799_v48  ;;  %v1856_v48 = vld [vmem:[%s3460_s1 + $0x3b0] sm:$0xff] }
  0x4a   : > { %2287 = vmatpush3.msra.mxu1 %v1822_v49  ;;  %2244 = vmatprep.subr.mxu0 %v1798_v50  ;;  %v1839_v49 = vld [vmem:[%s3460_s1 + $0x228] sm:$0xff] }
  0x4b   : > { %2288 = vmatprep.subr.mxu1 %v1821_v51  ;;  %2245 = vmatpush3.msra.mxu0 %v1798_v50  ;;  %v1838_v50 = vld [vmem:[%s3460_s1 + $0x220] sm:$0xff] }
  0x4c   : > { %2289 = vmatpush3.msra.mxu1 %v1821_v51  ;;  %2173 = vmatprep.mubr.msk.f32.mxu0 %vm334_vm0, %v2851_v47  ;;  %v1854_v51 = vld [vmem:[%s3460_s1 + $0x3a0] sm:$0xff] }
  0x4d   : > { %2217 = vmatprep.mubr.msk.f32.mxu1 %vm334_vm0, %v2840_v43  ;;  %2246 = vmatprep.subr.mxu0 %v1797_v29 }
  0x4e   : > { %2290 = vmatprep.subr.mxu1 %v1820_v52  ;;  %2174 = vmatmul.mubr.msk.f32.gmra.mxu0 %vm334_vm0, %v3019_v62 }
  0x4f   : > { %2218 = vmatmul.mubr.msk.f32.gmra.mxu1 %vm334_vm0, %v2851_v47  ;;  %2247 = vmatpush3.msra.mxu0 %v1797_v29  ;;  %v1837_v29 = vld [vmem:[%s3460_s1 + $0x218] sm:$0xff] }
  0x50   : > { %2291 = vmatpush3.msra.mxu1 %v1820_v52  ;;  %2248 = vmatprep.subr.mxu0 %v1796_v63  ;;  %v1853_v52 = vld [vmem:[%s3460_s1 + $0x398] sm:$0xff] }
  0x51   : > { %2292 = vmatprep.subr.mxu1 %v1819_v2  ;;  %2249 = vmatpush3.msra.mxu0 %v1796_v63  ;;  %v1836_v63 = vld [vmem:[%s3460_s1 + $0x210] sm:$0xff] }
  0x52   : > { %2293 = vmatpush3.msra.mxu1 %v1819_v2  ;;  %2250 = vmatprep.subr.mxu0 %v1795_v4  ;;  %v1852_v2 = vld [vmem:[%s3460_s1 + $0x390] sm:$0xff] }
  0x53   : > { %2294 = vmatprep.subr.mxu1 %v1818_v7  ;;  %2251 = vmatpush3.msra.mxu0 %v1795_v4  ;;  %v1851_v4 = vld [vmem:[%s3460_s1 + $0x388] sm:$0xff] }
  0x54   : > { %2252 = vmatprep.mubr.msk.f32.mxu0 %vm334_vm0, %v2765_v61  ;;  %2295 = vmatpush3.msra.mxu1 %v1818_v7  ;;  %v1864_v61 = vld [vmem:[%s3460_s1 + $0x3f0] sm:$0xff]  ;;  %v1834_v7 = vld [vmem:[%s3460_s1 + $0x200] sm:$0xff] }
  0x55   : > { %2253 = vmatmul.mubr.msk.f32.vlgmr.msra.gmra.mxu0 %vm334_vm0, %v2813_v25  ;;  %2296 = vmatprep.mubr.f32.mxu1 %v3048_v9  ;;  %v769_v25 = vrot.slane %v2849_v45, 1  ;;  %v1846_v45 = vld [vmem:[%s3460_s1 + $0x260] sm:$0xff] }
  0x56   : > { %2308 = vmatprep.subr.mxu0 %v1849_v1  ;;  %2352 = vmatprep.subr.mxu1 %v1865_v44 }
  0x57   : > { %2297 = vmatmul.mubr.f32.vlgmr.msra.gmra.mxu1 %v3060_v10  ;;  %2309 = vmatpush3.msra.mxu0 %v1849_v1  ;;  %v3096_v57 = vsel %vm759_vm3, %v769_v25, %v770_v17  ;;  %v1881_v1 = vld [vmem:[%s3460_s1 + $0x178] sm:$0xff]  ;;  %v1878_v25 = vld [vmem:[%s3460_s1 + $0x160] sm:$0xff] }
  0x58   : > { %2353 = vmatpush3.msra.mxu1 %v1865_v44  ;;  %2310 = vmatprep.subr.mxu0 %v1848_v12  ;;  %v1897_v44 = vld [vmem:[%s3460_s1 + $0x2f8] sm:$0xff]  ;;  %v1894_v17 = vld [vmem:[%s3460_s1 + $0x2e0] sm:$0xff] }
  0x59   : > { %2354 = vmatprep.subr.mxu1 %v1864_v61  ;;  %2255 = vmatprep.mubr.msk.f32.mxu0 %vm334_vm0, %v2827_v32  ;;  %v1862_v32 = vld [vmem:[%s3460_s1 + $0x3e0] sm:$0xff] }
  0x5a   : > { %2311 = vmatpush3.msra.mxu0 %v1848_v12  ;;  %2355 = vmatpush3.msra.mxu1 %v1864_v61  ;;  %v1880_v12 = vld [vmem:[%s3460_s1 + $0x170] sm:$0xff] }
  0x5b   : > { %2256 = vmatmul.mubr.msk.f32.gmra.mxu0 %vm334_vm0, %v2832_v37  ;;  %2312 = vmatprep.subr.mxu0 %v1847_v19  ;;  %v775_v37 = vrot.slane %v2868_v54, 1  ;;  %v3117_v54 = vsel %vm759_vm3, %v772_v20, %v773_v22  ;;  %v1896_v61 = vld [vmem:[%s3460_s1 + $0x2f0] sm:$0xff]  ;;  %v1891_v20 = vld [vmem:[%s3460_s1 + $0x2c8] sm:$0xff]  ;;  %v1874_v22 = vld [vmem:[%s3460_s1 + $0x140] sm:$0xff] }
  0x5c   : > { %2356 = vmatprep.subr.mxu1 %v1863_v11  ;;  %2299 = vmatprep.mubr.f32.mxu1 %v3087_v27 }
  0x5d   : > { %2313 = vmatpush3.msra.mxu0 %v1847_v19  ;;  %2357 = vmatpush3.msra.mxu1 %v1863_v11  ;;  %v3126_v0 = vsel %vm759_vm3, %v775_v37, %v776_v23  ;;  %v3248_v19 = vsel %vm341_vm1, %v328_v16, 0.0  ;;  %v1877_v11 = vld [vmem:[%s3460_s1 + $0x158] sm:$0xff]  ;;  %v1890_v37 = vld [vmem:[%s3460_s1 + $0x2c0] sm:$0xff] }
  0x5e   : > { %2314 = vmatprep.subr.mxu0 %v1846_v45  ;;  %2300 = vmatmul.mubr.f32.gmra.mxu1 %v3096_v57  ;;  %v785_v41 = vrot.slane %v3248_v19, 1  ;;  %v1873_v23 = vld [vmem:[%s3460_s1 + $0x138] sm:$0xff] }
  0x5f   : > { %2358 = vmatprep.subr.mxu1 %v1862_v32  ;;  %2258 = vmatprep.mubr.msk.f32.mxu0 %vm334_vm0, %v2840_v43  ;;  %v1860_v43 = vld [vmem:[%s3460_s1 + $0x3d0] sm:$0xff] }
  0x60   : > { %2315 = vmatpush3.msra.mxu0 %v1846_v45  ;;  %2359 = vmatpush3.msra.mxu1 %v1862_v32  ;;  %v1892_v45 = vld [vmem:[%s3460_s1 + $0x2d0] sm:$0xff]  ;;  %v1875_v32 = vld [vmem:[%s3460_s1 + $0x148] sm:$0xff] }
  0x61   : > { %2259 = vmatmul.mubr.msk.f32.gmra.mxu0 %vm334_vm0, %v2851_v47  ;;  %2316 = vmatprep.subr.mxu0 %v1845_v24  ;;  %v781_v47 = vrot.slane %v2889_v59, 1  ;;  %v3147_v59 = vsel %vm759_vm3, %v778_v34, %v779_v35  ;;  %v1869_v34 = vld [vmem:[%s3460_s1 + $0x118] sm:$0xff] }
  0x62   : > { %2360 = vmatprep.subr.mxu1 %v1861_v53  ;;  %2302 = vmatprep.mubr.f32.mxu1 %v3117_v54  ;;  %v1885_v35 = vld [vmem:[%s3460_s1 + $0x298] sm:$0xff] }
  0x63   : > { %2317 = vmatpush3.msra.mxu0 %v1845_v24  ;;  %2361 = vmatpush3.msra.mxu1 %v1861_v53  ;;  %v3154_v6 = vsel %vm759_vm3, %v781_v47, %v782_v36  ;;  %v1889_v24 = vld [vmem:[%s3460_s1 + $0x2b8] sm:$0xff]  ;;  %v1872_v53 = vld [vmem:[%s3460_s1 + $0x130] sm:$0xff] }
  0x64   : > { %2318 = vmatprep.subr.mxu0 %v1844_v58  ;;  %2303 = vmatmul.mubr.f32.gmra.mxu1 %v3126_v0  ;;  %v1868_v47 = vld [vmem:[%s3460_s1 + $0x110] sm:$0xff] }
  0x65   : > { %2362 = vmatprep.subr.mxu1 %v1860_v43  ;;  %2261 = vmatprep.mubr.msk.f32.mxu0 %vm334_vm0, %v3019_v62  ;;  %v1876_v62 = vld [vmem:[%s3460_s1 + $0x150] sm:$0xff] }
  0x66   : > { %2319 = vmatpush3.msra.mxu0 %v1844_v58  ;;  %2363 = vmatpush3.msra.mxu1 %v1860_v43  ;;  %v1871_v58 = vld [vmem:[%s3460_s1 + $0x128] sm:$0xff]  ;;  %v1886_v43 = vld [vmem:[%s3460_s1 + $0x2a0] sm:$0xff]  ;;  %v1884_v36 = vld [vmem:[%s3460_s1 + $0x290] sm:$0xff] }
  0x67   : > { %2262 = vmatmul.mubr.f32.gmra.mxu0 %v2578_v14  ;;  %2320 = vmatprep.subr.mxu0 %v1843_v38 }
  0x68   : > { %2364 = vmatprep.subr.mxu1 %v1859_v55  ;;  %2305 = vmatprep.mubr.f32.mxu1 %v3147_v59 }
  0x69   : > { %2321 = vmatpush3.msra.mxu0 %v1843_v38  ;;  %2365 = vmatpush3.msra.mxu1 %v1859_v55  ;;  %v1867_v38 = vld [vmem:[%s3460_s1 + $0x108] sm:$0xff] }
  0x6a   : > { %2322 = vmatprep.subr.mxu0 %v1842_v5  ;;  %2306 = vmatmul.mubr.f32.gmra.mxu1 %v3154_v6  ;;  %v1883_v55 = vld [vmem:[%s3460_s1 + $0x288] sm:$0xff] }
  0x6b   : > { %2366 = vmatprep.subr.mxu1 %v1858_v39  ;;  %2323 = vmatpush3.msra.mxu0 %v1842_v5  ;;  %v1882_v5 = vld [vmem:[%s3460_s1 + $0x280] sm:$0xff] }
  0x6c   : > { %2367 = vmatpush3.msra.mxu1 %v1858_v39  ;;  %2324 = vmatprep.subr.mxu0 %v1841_v40  ;;  %v1913_v39 = vld [vmem:[%s3460_s1 + $0x478] sm:$0xff] }
  0x6d   : > { %2368 = vmatprep.subr.mxu1 %v1857_v42  ;;  %2325 = vmatpush3.msra.mxu0 %v1841_v40  ;;  %v1911_v40 = vld [vmem:[%s3460_s1 + $0x468] sm:$0xff] }
  0x6e   : > { %2369 = vmatpush3.msra.mxu1 %v1857_v42  ;;  %2326 = vmatprep.subr.mxu0 %v1840_v46  ;;  %v1909_v42 = vld [vmem:[%s3460_s1 + $0x458] sm:$0xff] }
  0x6f   : > { %2370 = vmatprep.subr.mxu1 %v1856_v48  ;;  %2327 = vmatpush3.msra.mxu0 %v1840_v46  ;;  %v1908_v46 = vld [vmem:[%s3460_s1 + $0x450] sm:$0xff] }
  0x70   : > { %2371 = vmatpush3.msra.mxu1 %v1856_v48  ;;  %2328 = vmatprep.subr.mxu0 %v1839_v49  ;;  %v1215_v48 = vrot.slane %v3244_v26, 2 }
  0x71   : > { %2372 = vmatprep.subr.mxu1 %v1855_v21  ;;  %2329 = vmatpush3.msra.mxu0 %v1839_v49  ;;  %v1216_v49 = vrot.slane %v3248_v19, 2 }
  0x72   : > { %2373 = vmatpush3.msra.mxu1 %v1855_v21  ;;  %2330 = vmatprep.subr.mxu0 %v1838_v50  ;;  %v1907_v21 = vld [vmem:[%s3460_s1 + $0x448] sm:$0xff] }
  0x73   : > { %2374 = vmatprep.subr.mxu1 %v1854_v51  ;;  %2331 = vmatpush3.msra.mxu0 %v1838_v50  ;;  %v1906_v50 = vld [vmem:[%s3460_s1 + $0x440] sm:$0xff] }
  0x74   : > { %2375 = vmatpush3.msra.mxu1 %v1854_v51  ;;  %2332 = vmatprep.subr.mxu0 %v1837_v29  ;;  %v1217_v51 = vsel %vm1190_vm2, %v1215_v48, %v1216_v49 }
  0x75   : > { %2376 = vmatprep.subr.mxu1 %v1853_v52  ;;  %2333 = vmatpush3.msra.mxu0 %v1837_v29  ;;  %v1905_v29 = vld [vmem:[%s3460_s1 + $0x438] sm:$0xff] }
  0x76   : > { %2377 = vmatpush3.msra.mxu1 %v1853_v52  ;;  %2334 = vmatprep.subr.mxu0 %v1836_v63  ;;  %v1904_v52 = vld [vmem:[%s3460_s1 + $0x430] sm:$0xff] }
  0x77   : > { %2378 = vmatprep.subr.mxu1 %v1852_v2  ;;  %2335 = vmatpush3.msra.mxu0 %v1836_v63  ;;  %v1903_v63 = vld [vmem:[%s3460_s1 + $0x428] sm:$0xff] }
  0x78   : > { %2379 = vmatpush3.msra.mxu1 %v1852_v2  ;;  %2336 = vmatprep.subr.mxu0 %v1835_v3  ;;  %v1902_v2 = vld [vmem:[%s3460_s1 + $0x420] sm:$0xff] }
  0x79   : > { %2380 = vmatprep.subr.mxu1 %v1851_v4  ;;  %2337 = vmatpush3.msra.mxu0 %v1835_v3  ;;  %v1901_v3 = vld [vmem:[%s3460_s1 + $0x418] sm:$0xff] }
  0x7a   : > { %2381 = vmatpush3.msra.mxu1 %v1851_v4  ;;  %2338 = vmatprep.subr.mxu0 %v1834_v7  ;;  %v1900_v4 = vld [vmem:[%s3460_s1 + $0x410] sm:$0xff] }
  0x7b   : > { %2382 = vmatprep.subr.mxu1 %v1850_v8  ;;  %2339 = vmatpush3.msra.mxu0 %v1834_v7  ;;  %v1899_v7 = vld [vmem:[%s3460_s1 + $0x408] sm:$0xff] }
  0x7c   : > { %2340 = vmatprep.mubr.f32.mxu0 %v3060_v10  ;;  %2383 = vmatpush3.msra.mxu1 %v1850_v8  ;;  %v1879_v10 = vld [vmem:[%s3460_s1 + $0x168] sm:$0xff]  ;;  %v1898_v8 = vld [vmem:[%s3460_s1 + $0x400] sm:$0xff] }
  0x7d   : > { %2341 = vmatmul.mubr.f32.vlgmr.msra.gmra.mxu0 %v3087_v27  ;;  %2384 = vmatprep.mubr.f32.mxu1 %v3087_v27  ;;  %v1893_v27 = vld [vmem:[%s3460_s1 + $0x2d8] sm:$0xff] }
  0x7e   : > { %2396 = vmatprep.subr.mxu0 %v1881_v1  ;;  %2440 = vmatprep.subr.mxu1 %v1897_v44 }
  0x7f   : > { %2385 = vmatmul.mubr.f32.vlgmr.msra.gmra.mxu1 %v3096_v57  ;;  %2397 = vmatpush3.msra.mxu0 %v1881_v1 }
  0x80   : > { %2441 = vmatpush3.msra.mxu1 %v1897_v44  ;;  %2398 = vmatprep.subr.mxu0 %v1880_v12 }
  0x81   : > { %2442 = vmatprep.subr.mxu1 %v1896_v61  ;;  %2343 = vmatprep.mubr.f32.mxu0 %v3096_v57  ;;  %v786_v57 = vsel %vm759_vm3, %v784_v33, %v785_v41 }
  0x82   : > { %2399 = vmatpush3.msra.mxu0 %v1880_v12  ;;  %2443 = vmatpush3.msra.mxu1 %v1896_v61 }
  0x83   : > { %2344 = vmatmul.mubr.f32.gmra.mxu0 %v3117_v54  ;;  %2400 = vmatprep.subr.mxu0 %v1879_v10 }
  0x84   : > { %2444 = vmatprep.subr.mxu1 %v1895_v13  ;;  %2387 = vmatprep.mubr.f32.mxu1 %v3117_v54  ;;  %v1888_v54 = vld [vmem:[%s3460_s1 + $0x2b0] sm:$0xff] }
  0x85   : > { %2401 = vmatpush3.msra.mxu0 %v1879_v10  ;;  %2445 = vmatpush3.msra.mxu1 %v1895_v13 }
  0x86   : > { %2402 = vmatprep.subr.mxu0 %v1878_v25  ;;  %2388 = vmatmul.mubr.f32.gmra.mxu1 %v3126_v0 }
  0x87   : > { %2446 = vmatprep.subr.mxu1 %v1894_v17  ;;  %2346 = vmatprep.mubr.f32.mxu0 %v3126_v0  ;;  %v1870_v0 = vld [vmem:[%s3460_s1 + $0x120] sm:$0xff] }
  0x88   : > { %2403 = vmatpush3.msra.mxu0 %v1878_v25  ;;  %2447 = vmatpush3.msra.mxu1 %v1894_v17 }
  0x89   : > { %2347 = vmatmul.mubr.f32.gmra.mxu0 %v3147_v59  ;;  %2404 = vmatprep.subr.mxu0 %v1877_v11 }
  0x8a   : > { %2448 = vmatprep.subr.mxu1 %v1893_v27  ;;  %2390 = vmatprep.mubr.f32.mxu1 %v3147_v59  ;;  %v1866_v59 = vld [vmem:[%s3460_s1 + $0x100] sm:$0xff] }
  0x8b   : > { %2405 = vmatpush3.msra.mxu0 %v1877_v11  ;;  %2449 = vmatpush3.msra.mxu1 %v1893_v27 }
  0x8c   : > { %2406 = vmatprep.subr.mxu0 %v1876_v62  ;;  %2391 = vmatmul.mubr.f32.gmra.mxu1 %v3154_v6 }
  0x8d   : > { %2450 = vmatprep.subr.mxu1 %v1892_v45  ;;  %2349 = vmatprep.mubr.f32.mxu0 %v3154_v6  ;;  %v3333_v6 = vrot.slane %v2578_v14, 2  ;;  %v1912_v14 = vld [vmem:[%s3460_s1 + $0x470] sm:$0xff] }
  0x8e   : > { %2407 = vmatpush3.msra.mxu0 %v1876_v62  ;;  %2451 = vmatpush3.msra.mxu1 %v1892_v45 }
  0x8f   : > { %2350 = vmatmul.mubr.f32.gmra.mxu0 %v786_v57  ;;  %2408 = vmatprep.subr.mxu0 %v1875_v32 }
  0x90   : > { %2452 = vmatprep.subr.mxu1 %v1891_v20  ;;  %2393 = vmatprep.mubr.f32.mxu1 %v786_v57 }
  0x91   : > { %2409 = vmatpush3.msra.mxu0 %v1875_v32  ;;  %2453 = vmatpush3.msra.mxu1 %v1891_v20 }
  0x92   : > { %2410 = vmatprep.subr.mxu0 %v1874_v22  ;;  %2394 = vmatmul.mubr.f32.gmra.mxu1 %v3048_v9  ;;  %v1887_v9 = vld [vmem:[%s3460_s1 + $0x2a8] sm:$0xff] }
  0x93   : > { %2454 = vmatprep.subr.mxu1 %v1890_v37  ;;  %2411 = vmatpush3.msra.mxu0 %v1874_v22 }
  0x94   : > { %2455 = vmatpush3.msra.mxu1 %v1890_v37  ;;  %2412 = vmatprep.subr.mxu0 %v1873_v23 }
  0x95   : > { %2456 = vmatprep.subr.mxu1 %v1889_v24  ;;  %2413 = vmatpush3.msra.mxu0 %v1873_v23 }
  0x96   : > { %2457 = vmatpush3.msra.mxu1 %v1889_v24  ;;  %2414 = vmatprep.subr.mxu0 %v1872_v53 }
  0x97   : > { %2458 = vmatprep.subr.mxu1 %v1888_v54  ;;  %2415 = vmatpush3.msra.mxu0 %v1872_v53 }
  0x98   : > { %2459 = vmatpush3.msra.mxu1 %v1888_v54  ;;  %2416 = vmatprep.subr.mxu0 %v1871_v58 }
  0x99   : > { %2460 = vmatprep.subr.mxu1 %v1887_v9  ;;  %2417 = vmatpush3.msra.mxu0 %v1871_v58 }
  0x9a   : > { %2461 = vmatpush3.msra.mxu1 %v1887_v9  ;;  %2418 = vmatprep.subr.mxu0 %v1870_v0 }
  0x9b   : > { %2462 = vmatprep.subr.mxu1 %v1886_v43  ;;  %2419 = vmatpush3.msra.mxu0 %v1870_v0 }
  0x9c   : > { %2463 = vmatpush3.msra.mxu1 %v1886_v43  ;;  %2420 = vmatprep.subr.mxu0 %v1869_v34 }
  0x9d   : > { %2464 = vmatprep.subr.mxu1 %v1885_v35  ;;  %2421 = vmatpush3.msra.mxu0 %v1869_v34 }
  0x9e   : > { %2465 = vmatpush3.msra.mxu1 %v1885_v35  ;;  %2422 = vmatprep.subr.mxu0 %v1868_v47 }
  0x9f   : > { %2466 = vmatprep.subr.mxu1 %v1884_v36  ;;  %2423 = vmatpush3.msra.mxu0 %v1868_v47 }
  0xa0   : > { %2467 = vmatpush3.msra.mxu1 %v1884_v36  ;;  %2424 = vmatprep.subr.mxu0 %v1867_v38 }
  0xa1   : > { %2468 = vmatprep.subr.mxu1 %v1883_v55  ;;  %2425 = vmatpush3.msra.mxu0 %v1867_v38 }
  0xa2   : > { %2469 = vmatpush3.msra.mxu1 %v1883_v55  ;;  %2426 = vmatprep.subr.mxu0 %v1866_v59 }
  0xa3   : > { %2470 = vmatprep.subr.mxu1 %v1882_v5  ;;  %2427 = vmatpush3.msra.mxu0 %v1866_v59 }
  0xa4   : > { %2428 = vmatprep.mubr.f32.mxu0 %v3333_v6  ;;  %2471 = vmatpush3.msra.mxu1 %v1882_v5 }
  0xa5   : > { %2429 = vmatmul.mubr.f32.vlgmr.msra.gmra.mxu0 %v2894_v60  ;;  %2472 = vmatprep.mubr.f32.mxu1 %v2894_v60  ;;  %v1910_v60 = vld [vmem:[%s3460_s1 + $0x460] sm:$0xff] }
  0xa6   : > { %2484 = vmatprep.subr.mxu0 %v1913_v39  ;;  %2528 = vmatprep.subr.mxu1 %v1913_v39 }
  0xa7   : > { %2473 = vmatmul.mubr.f32.vlgmr.msra.gmra.mxu1 %v2876_v56  ;;  %2485 = vmatpush3.msra.mxu0 %v1913_v39 }
  0xa8   : > { %2544 = vmatpush3.msra.mxu1 %v1913_v39  ;;  %2486 = vmatprep.subr.mxu0 %v1912_v14 }
  0xa9   : > { %2529 = vmatprep.subr.mxu1 %v1912_v14  ;;  %2431 = vmatprep.mubr.f32.mxu0 %v2876_v56 }
  0xaa   : > { %2487 = vmatpush3.msra.mxu0 %v1912_v14  ;;  %2545 = vmatpush3.msra.mxu1 %v1912_v14 }
  0xab   : > { %2432 = vmatmul.mubr.f32.gmra.mxu0 %v2928_v15  ;;  %2488 = vmatprep.subr.mxu0 %v1911_v40 }
  0xac   : > { %2530 = vmatprep.subr.mxu1 %v1911_v40  ;;  %2475 = vmatprep.mubr.f32.mxu1 %v2928_v15 }
  0xad   : > { %2489 = vmatpush3.msra.mxu0 %v1911_v40  ;;  %2546 = vmatpush3.msra.mxu1 %v1911_v40 }
  0xae   : > { %2490 = vmatprep.subr.mxu0 %v1910_v60  ;;  %2476 = vmatmul.mubr.f32.gmra.mxu1 %v2933_v18 }
  0xaf   : > { %2531 = vmatprep.subr.mxu1 %v1910_v60  ;;  %2434 = vmatprep.mubr.f32.mxu0 %v2933_v18 }
  0xb0   : > { %2491 = vmatpush3.msra.mxu0 %v1910_v60  ;;  %2547 = vmatpush3.msra.mxu1 %v1910_v60 }
  0xb1   : > { %2435 = vmatmul.mubr.f32.gmra.mxu0 %v2948_v28  ;;  %2492 = vmatprep.subr.mxu0 %v1909_v42 }
  0xb2   : > { %2532 = vmatprep.subr.mxu1 %v1909_v42  ;;  %2478 = vmatprep.mubr.f32.mxu1 %v2948_v28 }
  0xb3   : > { %2493 = vmatpush3.msra.mxu0 %v1909_v42  ;;  %2548 = vmatpush3.msra.mxu1 %v1909_v42 }
  0xb4   : > { %2494 = vmatprep.subr.mxu0 %v1908_v46  ;;  %2479 = vmatmul.mubr.f32.gmra.mxu1 %v2951_v30 }
  0xb5   : > { %2533 = vmatprep.subr.mxu1 %v1908_v46  ;;  %2437 = vmatprep.mubr.f32.mxu0 %v2951_v30 }
  0xb6   : > { %2495 = vmatpush3.msra.mxu0 %v1908_v46  ;;  %2549 = vmatpush3.msra.mxu1 %v1908_v46 }
  0xb7   : > { %2438 = vmatmul.mubr.f32.gmra.mxu0 %v2954_v31  ;;  %2496 = vmatprep.subr.mxu0 %v1907_v21 }
  0xb8   : > { %2534 = vmatprep.subr.mxu1 %v1907_v21  ;;  %2481 = vmatprep.mubr.f32.mxu1 %v2954_v31 }
  0xb9   : > { %2497 = vmatpush3.msra.mxu0 %v1907_v21  ;;  %2550 = vmatpush3.msra.mxu1 %v1907_v21 }
  0xba   : > { %2498 = vmatprep.subr.mxu0 %v1906_v50  ;;  %2482 = vmatmul.mubr.f32.gmra.mxu1 %v1217_v51 }
  0xbb   : > { %2535 = vmatprep.subr.mxu1 %v1906_v50  ;;  %2499 = vmatpush3.msra.mxu0 %v1906_v50 }
  0xbc   : > { %2551 = vmatpush3.msra.mxu1 %v1906_v50  ;;  %2500 = vmatprep.subr.mxu0 %v1905_v29 }
  0xbd   : > { %2536 = vmatprep.subr.mxu1 %v1905_v29  ;;  %2501 = vmatpush3.msra.mxu0 %v1905_v29 }
  0xbe   : > { %2552 = vmatpush3.msra.mxu1 %v1905_v29  ;;  %2502 = vmatprep.subr.mxu0 %v1904_v52 }
  0xbf   : > { %2537 = vmatprep.subr.mxu1 %v1904_v52  ;;  %2503 = vmatpush3.msra.mxu0 %v1904_v52 }
  0xc0   : > { %2553 = vmatpush3.msra.mxu1 %v1904_v52  ;;  %2504 = vmatprep.subr.mxu0 %v1903_v63 }
  0xc1   : > { %2538 = vmatprep.subr.mxu1 %v1903_v63  ;;  %2505 = vmatpush3.msra.mxu0 %v1903_v63 }
  0xc2   : > { %2554 = vmatpush3.msra.mxu1 %v1903_v63  ;;  %2506 = vmatprep.subr.mxu0 %v1902_v2 }
  0xc3   : > { %2539 = vmatprep.subr.mxu1 %v1902_v2  ;;  %2507 = vmatpush3.msra.mxu0 %v1902_v2 }
  0xc4   : > { %2555 = vmatpush3.msra.mxu1 %v1902_v2  ;;  %2508 = vmatprep.subr.mxu0 %v1901_v3 }
  0xc5   : > { %2540 = vmatprep.subr.mxu1 %v1901_v3  ;;  %2509 = vmatpush3.msra.mxu0 %v1901_v3 }
  0xc6   : > { %2556 = vmatpush3.msra.mxu1 %v1901_v3  ;;  %2510 = vmatprep.subr.mxu0 %v1900_v4 }
  0xc7   : > { %2541 = vmatprep.subr.mxu1 %v1900_v4  ;;  %2511 = vmatpush3.msra.mxu0 %v1900_v4 }
  0xc8   : > { %2557 = vmatpush3.msra.mxu1 %v1900_v4  ;;  %2512 = vmatprep.subr.mxu0 %v1899_v7 }
  0xc9   : > { %2542 = vmatprep.subr.mxu1 %v1899_v7  ;;  %2513 = vmatpush3.msra.mxu0 %v1899_v7 }
  0xca   : > { %2558 = vmatpush3.msra.mxu1 %v1899_v7  ;;  %2514 = vmatprep.subr.mxu0 %v1898_v8 }
  0xcb   : > { %2543 = vmatprep.subr.mxu1 %v1898_v8  ;;  %2515 = vmatpush3.msra.mxu0 %v1898_v8 }
  0xcc   : > { %2559 = vmatpush3.msra.mxu1 %v1898_v8  ;;  %2516 = vmatprep.mubr.f32.mxu0 %v2876_v56 }
  0xcd   : > { %2522 = vmatprep.mubr.f32.mxu1 %v2951_v30  ;;  %2517 = vmatmul.mubr.f32.vlgmr.msra.gmra.mxu0 %v2928_v15 }
  0xce   : > { %2523 = vmatmul.mubr.f32.vlgmr.msra.gmra.mxu1 %v2954_v31  ;;  %2519 = vmatprep.mubr.f32.mxu0 %v2933_v18 }
  0xcf   : > { %2525 = vmatprep.mubr.f32.mxu1 %v1217_v51 }
  0xd1   : > { %2520 = vmatmul.mubr.f32.gmra.mxu0 %v2948_v28 }
  0xd2   : > { %2526 = vmatmul.mubr.f32.gmra.mxu1 %v3333_v6 }
  0xed   : > { %v2166_v1 = vpop.f32.mrf.mxu0 }
  0xee   : > { %v2210_v44 = vpop.f32.mrf.mxu1 }
  0xef   : > { %v465_v12 = vpop.f32.mrf.mxu0  ;;  %v576_v50 = vadd.f32 %v2210_v44, %v2166_v1 }
  0xf0   : > { %v570_v61 = vpop.f32.mrf.mxu1 }
  0xf1   : > { %v571_v29 = vadd.f32 %v570_v61, %v465_v12 }
 0x102   : > { %v2169_v10 = vpop.f32.mrf.mxu0 }
 0x103   : > { %v2213_v13 = vpop.f32.mrf.mxu1 }
 0x104   : > { %v475_v56 = vpop.f32.mrf.mxu0  ;;  %v586_v8 = vadd.f32 %v2213_v13, %v2169_v10 }
 0x105   : > { %v580_v16 = vpop.f32.mrf.mxu1 }
 0x108   : > { %v2172_v30 = vpop.f32.mrf.mxu0 }
 0x109   : > { %v2216_v25 = vpop.f32.mrf.mxu1 }
 0x10a   : > { %v485_v15 = vpop.f32.mrf.mxu0  ;;  %v596_v51 = vadd.f32 %v2216_v25, %v2172_v30 }
 0x10b   : > { %v590_v17 = vpop.f32.mrf.mxu1 }
 0x10c   : > { %v591_v2 = vadd.f32 %v590_v17, %v485_v15 }
 0x10e   : > { %v2175_v31 = vpop.f32.mrf.mxu0 }
 0x10f   : > { %v2219_v26 = vpop.f32.mrf.mxu1 }
 0x110   : > { %v495_v18 = vpop.f32.mrf.mxu0 }
 0x111   : > { %v600_v19 = vpop.f32.mrf.mxu1 }
 0x115   : > { %v2254_v11 = vpop.f32.mrf.mxu0 }
 0x116   : > { %v732_v3 = vadd.f32 %v2254_v11, %v576_v50 }
 0x117   : > { %v2298_v28 = vpop.f32.mrf.mxu1  ;;  %v692_v27 = vpop.f32.mrf.mxu0 }
 0x118   : > { %v731_v7 = vadd.f32 %v692_v27, %v571_v29 }
 0x119   : > { %v883_v33 = vpop.f32.mrf.mxu1 }
 0x11a   : > { %v922_v44 = vadd.f32 %v883_v33, %v731_v7 }
 0x11b   : > { %v2257_v41 = vpop.f32.mrf.mxu0 }
 0x11d   : > { %v702_v45 = vpop.f32.mrf.mxu0 }
 0x11e   : > { %v3408_v62 = vpop.f32.mrf.mxu1 }
 0x120   : > { %v3410_v57 = vpop.f32.mrf.mxu1 }
 0x121   : > { %3465 = vst [vmem:[#allocation2_spill] sm:$0xff] %v3410_v57  ;;  %v2260_v32 = vpop.f32.mrf.mxu0  ;;  %v734_v57 = vadd.f32 %v2257_v41, %v586_v8 }
 0x122   : > { %v736_v4 = vadd.f32 %v2260_v32, %v596_v51 }
 0x123   : > { %v712_v22 = vpop.f32.mrf.mxu0 }
 0x124   : > { %v2304_v20 = vpop.f32.mrf.mxu1 }
 0x125   : > { %v927_v1 = vadd.f32 %v2304_v20, %v736_v4 }
 0x126   : > { %v903_v37 = vpop.f32.mrf.mxu1 }
 0x127   : > { %v2263_v23 = vpop.f32.mrf.mxu0 }
 0x129   : > { %v722_v53 = vpop.f32.mrf.mxu0 }
 0x12a   : > { %v2307_v24 = vpop.f32.mrf.mxu1 }
 0x12c   : > { %v913_v54 = vpop.f32.mrf.mxu1 }
 0x13d   : > { %v2342_v58 = vpop.f32.mrf.mxu0 }
 0x13f   : > { %v2386_v9 = vpop.f32.mrf.mxu1  ;;  %v1013_v0 = vpop.f32.mrf.mxu0 }
 0x140   : > { %v1052_v11 = vadd.f32 %v1013_v0, %v922_v44 }
 0x141   : > { %v1143_v43 = vpop.f32.mrf.mxu1 }
 0x142   : > { %v1182_v41 = vadd.f32 %v1143_v43, %v1052_v11 }
 0x143   : > { %v2345_v34 = vpop.f32.mrf.mxu0 }
 0x145   : > { %v1023_v47 = vpop.f32.mrf.mxu0 }
 0x146   : > { %v3412_v35 = vpop.f32.mrf.mxu1 }
 0x147   : > { %3466 = vst [vmem:[#allocation3_spill] sm:$0xff] %v3412_v35  ;;  %v601_v35 = vadd.f32 %v600_v19, %v495_v18 }
 0x148   : > { %v3414_v36 = vpop.f32.mrf.mxu1 }
 0x149   : > { %3467 = vst [vmem:[#allocation4_spill] sm:$0xff] %v3414_v36  ;;  %v2348_v38 = vpop.f32.mrf.mxu0  ;;  %v737_v25 = vadd.f32 %v722_v53, %v601_v35 }
 0x14a   : > { %v1057_v17 = vadd.f32 %v2348_v38, %v927_v1 }
 0x14b   : > { %v1033_v59 = vpop.f32.mrf.mxu0  ;;  %v928_v19 = vadd.f32 %v913_v54, %v737_v25 }
 0x14c   : > { %v2392_v55 = vpop.f32.mrf.mxu1 }
 0x14d   : > { %v1187_v33 = vadd.f32 %v2392_v55, %v1057_v17 }
 0x14e   : > { %v1163_v5 = vpop.f32.mrf.mxu1 }
 0x14f   : > { %v2351_v6 = vpop.f32.mrf.mxu0 }
 0x151   : > { %v1043_v14 = vpop.f32.mrf.mxu0 }
 0x152   : > { %v3416_v39 = vpop.f32.mrf.mxu1 }
 0x153   : > { %3468 = vst [vmem:[#allocation5_spill] sm:$0xff] %v3416_v39  ;;  %v606_v39 = vadd.f32 %v2219_v26, %v2175_v31  ;;  %v3473_v31 = vld [vmem:[#allocation2_spill] sm:$0xff] }
 0x154   : > { %v3418_v40 = vpop.f32.mrf.mxu1 }
 0x155   : > { %3469 = vst [vmem:[#allocation6_spill] sm:$0xff] %v3418_v40  ;;  %v735_v40 = vadd.f32 %v712_v22, %v591_v2  ;;  %v738_v61 = vadd.f32 %v2263_v23, %v606_v39  ;;  %v1058_v23 = vadd.f32 %v1043_v14, %v928_v19 }
 0x157   : > { %v926_v30 = vadd.f32 %v903_v37, %v735_v40  ;;  %v929_v18 = vadd.f32 %v2307_v24, %v738_v61  ;;  %v3475_v24 = vld [vmem:[#allocation4_spill] sm:$0xff] }
 0x159   : > { %v1059_v32 = vadd.f32 %v2351_v6, %v929_v18 }
 0x15c   : > { %v3477_v43 = vld [vmem:[#allocation6_spill] sm:$0xff] }
 0x165   : > { %v2430_v60 = vpop.f32.mrf.mxu0 }
 0x167   : > { %v3420_v42 = vpop.f32.mrf.mxu1  ;;  %v1314_v46 = vpop.f32.mrf.mxu0 }
 0x168   : > { %3470 = vst [vmem:[#allocation7_spill] sm:$0xff] %v3420_v42  ;;  %v581_v42 = vadd.f32 %v580_v16, %v475_v56  ;;  %v925_v56 = vadd.f32 %v3408_v62, %v734_v57  ;;  %v1056_v16 = vadd.f32 %v1033_v59, %v926_v30  ;;  %v1353_v0 = vadd.f32 %v1314_v46, %v1182_v41  ;;  %v3474_v62 = vld [vmem:[#allocation3_spill] sm:$0xff] }
 0x169   : > { %v3422_v48 = vpop.f32.mrf.mxu1 }
 0x16a   : > { %3471 = vst [vmem:[#allocation8_spill] sm:$0xff] %v3422_v48  ;;  %v733_v12 = vadd.f32 %v702_v45, %v581_v42  ;;  %v1055_v27 = vadd.f32 %v2345_v34, %v925_v56  ;;  %v1186_v37 = vadd.f32 %v1163_v5, %v1056_v16 }
 0x16b   : > { %v2433_v49 = vpop.f32.mrf.mxu0 }
 0x16c   : > { %v924_v26 = vadd.f32 %v3473_v31, %v733_v12  ;;  %v1185_v57 = vadd.f32 %v3474_v62, %v1055_v27 }
 0x16d   : > { %v1324_v52 = vpop.f32.mrf.mxu0 }
 0x16e   : > { %v3424_v21 = vpop.f32.mrf.mxu1  ;;  %v1054_v45 = vadd.f32 %v1023_v47, %v924_v26  ;;  %v1188_v47 = vadd.f32 %v3477_v43, %v1058_v23  ;;  %v1356_v39 = vadd.f32 %v2433_v49, %v1185_v57 }
 0x16f   : > { %3472 = vst [vmem:[#allocation9_spill] sm:$0xff] %v3424_v21  ;;  %v923_v21 = vadd.f32 %v2298_v28, %v732_v3  ;;  %v3478_v59 = vld [vmem:[#allocation7_spill] sm:$0xff] }
 0x170   : > { %v3426_v63 = vpop.f32.mrf.mxu1  ;;  %v1184_v54 = vadd.f32 %v3475_v24, %v1054_v45 }
 0x171   : > { %v2436_v36 = vpop.f32.mrf.mxu0  ;;  %v1053_v15 = vadd.f32 %v2342_v58, %v923_v21  ;;  %v3479_v14 = vld [vmem:[#allocation8_spill] sm:$0xff] }
 0x172   : > { %v1358_v58 = vadd.f32 %v2436_v36, %v1187_v33  ;;  %v1483_v40 = vadd.f32 %v3479_v14, %v1353_v0  ;;  %v1355_v36 = vadd.f32 %v1324_v52, %v1184_v54 }
 0x173   : > { %v1334_v10 = vpop.f32.mrf.mxu0  ;;  %v1183_v28 = vadd.f32 %v2386_v9, %v1053_v15  ;;  %v3476_v9 = vld [vmem:[#allocation5_spill] sm:$0xff] }
 0x174   : > { %v2480_v48 = vpop.f32.mrf.mxu1  ;;  %v1357_v35 = vadd.f32 %v1334_v10, %v1186_v37  ;;  %v1189_v34 = vadd.f32 %v3476_v9, %v1059_v32  ;;  %v1485_v44 = vadd.f32 %v3426_v63, %v1355_v36 }
 0x175   : > { %v1354_v53 = vadd.f32 %v2430_v60, %v1183_v28  ;;  %v1488_v5 = vadd.f32 %v2480_v48, %v1358_v58 }
 0x176   : > { %v1464_v13 = vpop.f32.mrf.mxu1  ;;  %v3480_v2 = vld [vmem:[#allocation9_spill] sm:$0xff] }
 0x177   : > { %v2439_v20 = vpop.f32.mrf.mxu0  ;;  %v1484_v6 = vadd.f32 %v3478_v59, %v1354_v53  ;;  %v1487_v21 = vadd.f32 %v1464_v13, %v1357_v35  ;;  %v1486_v52 = vadd.f32 %v3480_v2, %v1356_v39 }
 0x178   : > { %v1360_v60 = vadd.f32 %v2439_v20, %v1189_v34 }
 0x179   : > { %v1344_v38 = vpop.f32.mrf.mxu0 }
 0x17a   : > { %v2483_v22 = vpop.f32.mrf.mxu1  ;;  %v1359_v50 = vadd.f32 %v1344_v38, %v1188_v47 }
 0x17b   : > { %v1490_v7 = vadd.f32 %v2483_v22, %v1360_v60 }
 0x17c   : > { %v1474_v55 = vpop.f32.mrf.mxu1 }
 0x17d   : > { %v1489_v12 = vadd.f32 %v1474_v55, %v1359_v50 }
 0x18d   : > { %v2518_v42 = vpop.f32.mrf.mxu0 }
 0x18e   : > { %v2524_v46 = vpop.f32.mrf.mxu1  ;;  %v1614_v51 = vadd.f32 %v2518_v42, %v1484_v6 }
 0x18f   : > { %v1618_v49 = vadd.f32 %v2524_v46, %v1488_v5  ;;  %v1574_v48 = vpop.f32.mrf.mxu0 }
 0x190   : > { %v1594_v29 = vpop.f32.mrf.mxu1  ;;  %1622 = vst [vmem:[%s3440_s10 + $0x8] sm:$0xff] %v1614_v51  ;;  %v1613_v3 = vadd.f32 %v1574_v48, %v1483_v40  ;;  %v1643_v11 = vmul.f32 %v1614_v51, %v1614_v51 }
 0x191   : > { %1626 = vst [vmem:[%s3440_s10 + $0x28] sm:$0xff] %v1618_v49  ;;  %v1617_v4 = vadd.f32 %v1594_v29, %v1487_v21  ;;  %v2521_v8 = vpop.f32.mrf.mxu0  ;;  %v1647_v41 = vmul.f32 %v1618_v49, %v1618_v49 }
 0x192   : > { %v2527_v1 = vpop.f32.mrf.mxu1  ;;  %1621 = vst [vmem:[%s3440_s10] sm:$0xff] %v1613_v3  ;;  %v1642_v61 = vmul.f32 %v1613_v3, %v1613_v3  ;;  %v1616_v30 = vadd.f32 %v2521_v8, %v1486_v52  ;;  %v1629_v10 = vadd.f32 %v1614_v51, %v1613_v3 }
 0x193   : > { %1625 = vst [vmem:[%s3440_s10 + $0x20] sm:$0xff] %v1617_v4  ;;  %v1620_v25 = vadd.f32 %v2527_v1, %v1490_v7  ;;  %v1584_v15 = vpop.f32.mrf.mxu0  ;;  %v1646_v28 = vmul.f32 %v1617_v4, %v1617_v4 }
 0x194   : > { %v1604_v17 = vpop.f32.mrf.mxu1  ;;  %1624 = vst [vmem:[%s3440_s10 + $0x18] sm:$0xff] %v1616_v30  ;;  %v1615_v13 = vadd.f32 %v1584_v15, %v1485_v44  ;;  %v1650_v16 = vadd.f32 %v1643_v11, %v1642_v61  ;;  %v1645_v26 = vmul.f32 %v1616_v30, %v1616_v30 }
 0x195   : > { %v1619_v56 = vadd.f32 %v1604_v17, %v1489_v12  ;;  %1628 = vst [vmem:[%s3440_s10 + $0x38] sm:$0xff] %v1620_v25  ;;  %v1649_v23 = vmul.f32 %v1620_v25, %v1620_v25 }
 0x196   : > { %1623 = vst [vmem:[%s3440_s10 + $0x10] sm:$0xff] %v1615_v13  ;;  %v1630_v31 = vadd.f32 %v1629_v10, %v1615_v13  ;;  %v1644_v63 = vmul.f32 %v1615_v13, %v1615_v13 }
 0x197   : > { %1627 = vst [vmem:[%s3440_s10 + $0x30] sm:$0xff] %v1619_v56  ;;  %v1648_v22 = vmul.f32 %v1619_v56, %v1619_v56 }
 0x198   : > { %v1631_v18 = vadd.f32 %v1630_v31, %v1616_v30  ;;  %v1651_v19 = vadd.f32 %v1650_v16, %v1644_v63 }
 0x19a   : > { %v1652_v27 = vadd.f32 %v1651_v19, %v1645_v26  ;;  %v1632_v33 = vadd.f32 %v1631_v18, %v1617_v4 }
 0x19c   : > { %v1633_v45 = vadd.f32 %v1632_v33, %v1618_v49  ;;  %v1653_v32 = vadd.f32 %v1652_v27, %v1646_v28 }
 0x19e   : > { %v1634_v20 = vadd.f32 %v1633_v45, %v1619_v56  ;;  %v1654_v37 = vadd.f32 %v1653_v32, %v1647_v41 }
 0x1a0   : > { %v1635_v53 = vadd.f32 %v1634_v20, %v1620_v25  ;;  %v1655_v58 = vadd.f32 %v1654_v37, %v1648_v22 }
 0x1a2   : > { %v1636_v0 = vrot.slane %v1635_v53, 4  ;;  %v1656_v62 = vadd.f32 %v1655_v58, %v1649_v23 }
 0x1a4   : > { %v1637_v57 = vadd.f32 %v1636_v0, %v1635_v53  ;;  %v1657_v35 = vrot.slane %v1656_v62, 4 }
 0x1a6   : > { %v1638_v24 = vrot.slane %v1637_v57, 2  ;;  %v1658_v54 = vadd.f32 %v1657_v35, %v1656_v62 }
 0x1a8   : > { %v1639_v9 = vadd.f32 %v1638_v24, %v1637_v57  ;;  %v1659_v34 = vrot.slane %v1658_v54, 2 }
 0x1aa   : > { %v1640_v38 = vrot.slane %v1639_v9, 1  ;;  %v1660_v55 = vadd.f32 %v1659_v34, %v1658_v54 }
 0x1ac   : > { %v1661_v43 = vrot.slane %v1660_v55, 1  ;;  %v1641_v47 = vadd.f32 %v1640_v38, %v1639_v9 }
 0x1ae   : > { %v1662_v59 = vadd.f32 %v1661_v43, %v1660_v55 }
 0x1b0   : > { %v1664_v6 = vsel %vm1663_vm4, %v1641_v47, %v1662_v59 }
 0x1b1   : > { %1665 = vst [vmem:[%s236_s16] sm:$0x3] %v1664_v6 }
 0x1b2 PF: > { %s16_s18 = sadd.s32 1, %s2576_s18  }
 0x1b3   : > { %p13_p5 = scmp.ge.s32.totalorder %s16_s18, 4  }
 0x1b5   :  { %15 = sbr.rel (!%p13_p5) target bundleno = 1 (0x1), region = 86 }

</bundles_post_ra>
